<compile_context>
chip_gen: v6e
topology: v6e:2x2x1
jax: 0.10.0
libtpu: 0.0.40
codegen_flags: <defaults>
</compile_context>

<pallas_src>
import math

import jax
import jax.numpy as jnp
from jax.experimental import pallas as pl
from jax.experimental.pallas import tpu as pltpu


# ----------------------------- model config (tiny ByT5-style) ----------------
VOCAB = 384          # byt5 byte vocab
D_MODEL = 32
N_HEADS = 4
D_KV = 8             # per-head dim, N_HEADS * D_KV == D_MODEL
D_FF = 64
N_LAYERS = 2
REL_BUCKETS = 32
REL_MAX_DIST = 128
BATCH = 2
SEQ = 8


# ----------------------------- in-kernel helpers ------------------------------
def _gelu_new(x):
    # T5 "gelu_new" (tanh approximation), matches HF NewGELUActivation.
    return 0.5 * x * (1.0 + jnp.tanh(
        math.sqrt(2.0 / math.pi) * (x + 0.044715 * x * x * x)))


def _rmsnorm(x, w):
    # T5LayerNorm: mean-free RMS norm, eps = 1e-6.
    var = jnp.mean(x * x, axis=-1, keepdims=True)
    return x * jax.lax.rsqrt(var + 1e-6) * w


# ----------------------------- fused encoder kernel ---------------------------
def _encoder_kernel(ids_ref, embed_ref, bias_ref, pool_ref,
                    ln1_ref, wqkv_ref, wo_ref,
                    ln2_ref, wi_ref, woff_ref, fln_ref,
                    pooled_ref):
    L, HH3, D, DH = wqkv_ref.shape          # (L, 3*H, D, Dh)
    H = HH3 // 3
    BS = ids_ref.shape[0]                   # B * S
    DFF = woff_ref.shape[1]

    # ---- in-kernel byte embedding: one-hot (BS, VOCAB) @ (VOCAB, D) on the MXU ----
    ids = ids_ref[...]                                               # (BS, 1) int32
    hot = (jax.lax.broadcasted_iota(jnp.int32, (BS, VOCAB), 1) == ids)
    h = jnp.dot(hot.astype(jnp.float32), embed_ref[...],
                preferred_element_type=jnp.float32)                  # (BS, D)

    bias = bias_ref[...]                                             # (H, BS, BS)

    # ---- encoder stack: static layer loop, hidden state stays in registers ----
    for l in range(L):
        # ---------------- self-attention (heads batched on the leading axis) ---
        xn = _rmsnorm(h, ln1_ref[l])                                 # (BS, D)
        xb = jnp.broadcast_to(xn[None], (HH3, BS, D))                # (3H, BS, D)
        qkv = jnp.einsum('hmd,hdk->hmk', xb, wqkv_ref[l],
                         preferred_element_type=jnp.float32)         # (3H, BS, Dh)
        q, k, v = qkv[:H], qkv[H:2 * H], qkv[2 * H:]                 # leading slices

        # T5 attention: no 1/sqrt(d) scaling; bias = rel-pos + key mask,
        # block-diagonal over sequences (cross-sequence entries are -1e9).
        sc = jnp.einsum('hqd,hkd->hqk', q, k,
                        preferred_element_type=jnp.float32) + bias   # (H, BS, BS)
        m = jnp.max(sc, axis=-1, keepdims=True)
        p = jnp.exp(sc - m)
        ssum = jnp.sum(p, axis=-1, keepdims=True)
        ctx = jnp.einsum('hqk,hkd->hqd', p, v,
                         preferred_element_type=jnp.float32)         # (H, BS, Dh)
        ctx = ctx / ssum                                             # exact softmax

        o = jnp.einsum('hmd,hdk->hmk', ctx, wo_ref[l],
                       preferred_element_type=jnp.float32)           # (H, BS, D)
        h = h + jnp.sum(o, axis=0)                                   # one residual add

        # ---------------- gated-GELU FFN (fused wi_0|wi_1, lane-dense 128) -----
        xn = _rmsnorm(h, ln2_ref[l])
        hi = jnp.dot(xn, wi_ref[l], preferred_element_type=jnp.float32)  # (BS, 2*DFF)
        hg = _gelu_new(hi[:, :DFF]) * hi[:, DFF:]
        h = h + jnp.dot(hg, woff_ref[l], preferred_element_type=jnp.float32)

    # ---- final RMSNorm + masked mean pooling as one (B, BS) @ (BS, D) dot ----
    hn = _rmsnorm(h, fln_ref[...])                                   # (BS, D)
    pooled_ref[...] = jnp.dot(pool_ref[...], hn,
                              preferred_element_type=jnp.float32)    # (B, D), one store


# ----------------------------- glue: T5 relative position bias ----------------
def relative_position_bucket(rel_pos, num_buckets=REL_BUCKETS,
                             max_distance=REL_MAX_DIST):
    # bidirectional bucketing, as in HF T5Attention._relative_position_bucket
    num_buckets = num_buckets // 2
    buckets = (rel_pos > 0).astype(jnp.int32) * num_buckets
    rel_pos = jnp.abs(rel_pos)
    max_exact = num_buckets // 2
    is_small = rel_pos < max_exact
    rp_safe = jnp.maximum(rel_pos, 1)
    rel_if_large = max_exact + (
        jnp.log(rp_safe.astype(jnp.float32) / max_exact)
        / math.log(max_distance / max_exact)
        * (num_buckets - max_exact)
    ).astype(jnp.int32)
    rel_if_large = jnp.minimum(rel_if_large, num_buckets - 1)
    return buckets + jnp.where(is_small, rel_pos, rel_if_large)


def compute_position_bias(rel_emb, seq_len):
    ctx = jnp.arange(seq_len)[:, None]
    mem = jnp.arange(seq_len)[None, :]
    buckets = relative_position_bucket(mem - ctx)          # (S, S)
    bias = rel_emb[buckets]                                 # (S, S, H)
    return jnp.transpose(bias, (2, 0, 1))                   # (H, S, S)


# ----------------------------- parameter init ---------------------------------
def init_params(key):
    def nrm(k, shape, scale=0.02):
        return (scale * jax.random.normal(k, shape)).astype(jnp.float32)

    keys = jax.random.split(key, 6)
    return {
        'embed': nrm(keys[0], (VOCAB, D_MODEL), 1.0),
        'rel_emb': nrm(keys[1], (REL_BUCKETS, N_HEADS)),
        'final_ln': jnp.ones((1, D_MODEL), jnp.float32),
        'ln1': jnp.ones((N_LAYERS, 1, D_MODEL), jnp.float32),
        'ln2': jnp.ones((N_LAYERS, 1, D_MODEL), jnp.float32),
        # Per-head weight tiles on LEADING axes (no in-kernel lane slicing):
        # wqkv[l] = [Wq_h0..Wq_h3, Wk_h0..Wk_h3, Wv_h0..Wv_h3], each (D, Dh).
        'wqkv': nrm(keys[2], (N_LAYERS, 3 * N_HEADS, D_MODEL, D_KV)),
        'wo': nrm(keys[3], (N_LAYERS, N_HEADS, D_KV, D_MODEL)),
        'wi': nrm(keys[4], (N_LAYERS, D_MODEL, 2 * D_FF)),      # wi_0|wi_1 fused
        'wo_ff': nrm(keys[5], (N_LAYERS, D_FF, D_MODEL)),
    }


# ----------------------------- forward -----------------------------------------
@jax.jit
def byt5_embedder_forward(params, input_ids, attention_mask):
    B, S = input_ids.shape
    BS = B * S
    mask_f = attention_mask.astype(jnp.float32)                       # (B, S)

    # Layer-invariant attention bias, flattened to a block-diagonal (H, BS, BS):
    # inside a sequence -> shared layer-0 rel-pos bias + additive key mask,
    # across sequences -> -1e9 (softmax weight underflows to exactly 0).
    pos = compute_position_bias(params['rel_emb'], S)                 # (H, S, S)
    pos_full = jnp.tile(pos, (1, B, B))                               # (H, BS, BS)
    key_mask = ((1.0 - mask_f) * -1e9).reshape(BS)                    # (BS,)
    row = jnp.arange(BS)
    same_seq = (row[:, None] // S) == (row[None, :] // S)             # (BS, BS)
    bias = jnp.where(same_seq[None],
                     pos_full + key_mask[None, None, :],
                     -1e9).astype(jnp.float32)                        # (H, BS, BS)

    # Masked-mean pooling folded into a single (B, BS) pooling matrix.
    w = mask_f / jnp.maximum(mask_f.sum(axis=1, keepdims=True), 1e-9) # (B, S)
    pool_mat = jnp.where((row[None, :] // S) == jnp.arange(B)[:, None],
                         w.reshape(1, BS), 0.0).astype(jnp.float32)   # (B, BS)

    ids2d = input_ids.reshape(BS, 1).astype(jnp.int32)

    n_in = 11
    pooled = pl.pallas_call(
        _encoder_kernel,
        out_shape=jax.ShapeDtypeStruct((B, D_MODEL), jnp.float32),
        in_specs=[pl.BlockSpec(memory_space=pltpu.MemorySpace.VMEM)] * n_in,
        out_specs=pl.BlockSpec(memory_space=pltpu.MemorySpace.VMEM),
    )(ids2d, params['embed'], bias, pool_mat,
      params['ln1'], params['wqkv'], params['wo'],
      params['ln2'], params['wi'], params['wo_ff'], params['final_ln'])
    return pooled


# ----------------------------- main ---------------------------------------------
if __name__ == "__main__":
    key = jax.random.PRNGKey(0)
    pkey, ikey = jax.random.split(key)
    params = init_params(pkey)

    input_ids = jax.random.randint(ikey, (BATCH, SEQ), 0, VOCAB, dtype=jnp.int32)
    attention_mask = jnp.array(
        [[1, 1, 1, 1, 1, 1, 1, 1],
         [1, 1, 1, 1, 1, 0, 0, 0]], dtype=jnp.int32)

    pooled = byt5_embedder_forward(params, input_ids, attention_mask)
    pooled = jax.block_until_ready(pooled)
    assert pooled.shape == (BATCH, D_MODEL)
    assert bool(jnp.all(jnp.isfinite(pooled)))
    print("KERNEL_OK")
</pallas_src>

<mosaic_0001>
module attributes {stable_mosaic.version = 11 : i64} {
  func.func @_encoder_kernel(%arg0: memref<16x1xi32, #tpu.memory_space<vmem>>, %arg1: memref<384x32xf32, #tpu.memory_space<vmem>>, %arg2: memref<4x16x16xf32, #tpu.memory_space<vmem>>, %arg3: memref<2x16xf32, #tpu.memory_space<vmem>>, %arg4: memref<2x1x32xf32, #tpu.memory_space<vmem>>, %arg5: memref<2x12x32x8xf32, #tpu.memory_space<vmem>>, %arg6: memref<2x4x8x32xf32, #tpu.memory_space<vmem>>, %arg7: memref<2x1x32xf32, #tpu.memory_space<vmem>>, %arg8: memref<2x32x128xf32, #tpu.memory_space<vmem>>, %arg9: memref<2x64x32xf32, #tpu.memory_space<vmem>>, %arg10: memref<1x32xf32, #tpu.memory_space<vmem>>, %arg11: memref<2x32xf32, #tpu.memory_space<vmem>>) attributes {dimension_semantics = [], scalar_prefetch = 0 : i64, scratch_operands = 0 : i64, tpu.core_type = #tpu.core_type<tc>} {
    %c0 = arith.constant 0 : index
    %c0_0 = arith.constant 0 : index
    %0 = vector.load %arg0[%c0, %c0_0] : memref<16x1xi32, #tpu.memory_space<vmem>>, vector<16x1xi32>
    %1 = tpu.iota {dimensions = array<i32: 1>} : vector<16x384xi32>
    %2 = vector.broadcast %0 : vector<16x1xi32> to vector<16x384xi32>
    %3 = arith.cmpi eq, %1, %2 : vector<16x384xi32>
    %4 = arith.extui %3 : vector<16x384xi1> to vector<16x384xi32>
    %5 = arith.sitofp %4 : vector<16x384xi32> to vector<16x384xf32>
    %c0_1 = arith.constant 0 : index
    %c0_2 = arith.constant 0 : index
    %6 = vector.load %arg1[%c0_1, %c0_2] : memref<384x32xf32, #tpu.memory_space<vmem>>, vector<384x32xf32>
    %cst = arith.constant dense<0.000000e+00> : vector<16x32xf32>
    %7 = tpu.matmul %5, %6, %cst {dimension_numbers = #tpu.dot_dimension_numbers<[1], [0], [0], [1], [0, 0, 1, 1], [], []>} : vector<16x384xf32>, vector<384x32xf32>, vector<16x32xf32> -> vector<16x32xf32>
    %c0_3 = arith.constant 0 : index
    %c0_4 = arith.constant 0 : index
    %c0_5 = arith.constant 0 : index
    %8 = vector.load %arg2[%c0_3, %c0_4, %c0_5] : memref<4x16x16xf32, #tpu.memory_space<vmem>>, vector<4x16x16xf32>
    %c0_6 = arith.constant 0 : index
    %c0_7 = arith.constant 0 : index
    %c0_8 = arith.constant 0 : index
    %9 = vector.load %arg4[%c0_6, %c0_7, %c0_8] : memref<2x1x32xf32, #tpu.memory_space<vmem>>, vector<1x1x32xf32>
    %10 = vector.shape_cast %9 : vector<1x1x32xf32> to vector<1x32xf32>
    %11 = arith.mulf %7, %7 : vector<16x32xf32>
    %cst_9 = arith.constant dense<0.000000e+00> : vector<16xf32>
    %12 = vector.multi_reduction <add>, %11, %cst_9 [1] : vector<16x32xf32> to vector<16xf32>
    %13 = vector.shape_cast %12 : vector<16xf32> to vector<16x1xf32>
    %cst_10 = arith.constant 3.200000e+01 : f32
    %14 = vector.broadcast %cst_10 : f32 to vector<16x1xf32>
    %15 = arith.divf %13, %14 : vector<16x1xf32>
    %cst_11 = arith.constant 9.99999997E-7 : f32
    %16 = vector.broadcast %cst_11 : f32 to vector<16x1xf32>
    %17 = arith.addf %15, %16 : vector<16x1xf32>
    %18 = math.rsqrt %17 : vector<16x1xf32>
    %19 = vector.broadcast %18 : vector<16x1xf32> to vector<16x32xf32>
    %20 = arith.mulf %7, %19 : vector<16x32xf32>
    %21 = vector.broadcast %10 : vector<1x32xf32> to vector<16x32xf32>
    %22 = arith.mulf %20, %21 : vector<16x32xf32>
    %23 = vector.shape_cast %22 : vector<16x32xf32> to vector<1x16x32xf32>
    %24 = vector.shape_cast %23 : vector<1x16x32xf32> to vector<1x16x32xf32>
    %25 = vector.broadcast %24 : vector<1x16x32xf32> to vector<12x16x32xf32>
    %c0_12 = arith.constant 0 : index
    %c0_13 = arith.constant 0 : index
    %c0_14 = arith.constant 0 : index
    %c0_15 = arith.constant 0 : index
    %26 = vector.load %arg5[%c0_12, %c0_13, %c0_14, %c0_15] : memref<2x12x32x8xf32, #tpu.memory_space<vmem>>, vector<1x12x32x8xf32>
    %27 = vector.shape_cast %26 : vector<1x12x32x8xf32> to vector<12x32x8xf32>
    "tpu.trace_start"() <{level = 10 : i32, message = "hmd,hdk->hmk"}> : () -> ()
    %cst_16 = arith.constant dense<0.000000e+00> : vector<12x16x8xf32>
    %28 = tpu.matmul %25, %27, %cst_16 {dimension_numbers = #tpu.dot_dimension_numbers<[2], [1], [1], [2], [0, 0, 0, 1, 1, 2], [0], [0]>} : vector<12x16x32xf32>, vector<12x32x8xf32>, vector<12x16x8xf32> -> vector<12x16x8xf32>
    "tpu.trace_stop"() : () -> ()
    %29 = vector.extract_strided_slice %28 {offsets = [0, 0, 0], sizes = [4, 16, 8], strides = [1, 1, 1]} : vector<12x16x8xf32> to vector<4x16x8xf32>
    %30 = vector.extract_strided_slice %28 {offsets = [4, 0, 0], sizes = [4, 16, 8], strides = [1, 1, 1]} : vector<12x16x8xf32> to vector<4x16x8xf32>
    %31 = vector.extract_strided_slice %28 {offsets = [8, 0, 0], sizes = [4, 16, 8], strides = [1, 1, 1]} : vector<12x16x8xf32> to vector<4x16x8xf32>
    "tpu.trace_start"() <{level = 10 : i32, message = "hqd,hkd->hqk"}> : () -> ()
    %cst_17 = arith.constant dense<0.000000e+00> : vector<4x16x16xf32>
    %32 = tpu.matmul %29, %30, %cst_17 {dimension_numbers = #tpu.dot_dimension_numbers<[2], [2], [1], [1], [0, 0, 0, 1, 1, 1], [0], [0]>} : vector<4x16x8xf32>, vector<4x16x8xf32>, vector<4x16x16xf32> -> vector<4x16x16xf32>
    "tpu.trace_stop"() : () -> ()
    %33 = arith.addf %32, %8 : vector<4x16x16xf32>
    %cst_18 = arith.constant dense<0xFF800000> : vector<4x16xf32>
    %34 = vector.multi_reduction <maximumf>, %33, %cst_18 [2] : vector<4x16x16xf32> to vector<4x16xf32>
    %35 = vector.shape_cast %34 : vector<4x16xf32> to vector<4x16x1xf32>
    %36 = vector.broadcast %35 : vector<4x16x1xf32> to vector<4x16x16xf32>
    %37 = arith.subf %33, %36 : vector<4x16x16xf32>
    %38 = math.exp %37 : vector<4x16x16xf32>
    %cst_19 = arith.constant dense<0.000000e+00> : vector<4x16xf32>
    %39 = vector.multi_reduction <add>, %38, %cst_19 [2] : vector<4x16x16xf32> to vector<4x16xf32>
    %40 = vector.shape_cast %39 : vector<4x16xf32> to vector<4x16x1xf32>
    "tpu.trace_start"() <{level = 10 : i32, message = "hqk,hkd->hqd"}> : () -> ()
    %cst_20 = arith.constant dense<0.000000e+00> : vector<4x16x8xf32>
    %41 = tpu.matmul %38, %31, %cst_20 {dimension_numbers = #tpu.dot_dimension_numbers<[2], [1], [1], [2], [0, 0, 0, 1, 1, 2], [0], [0]>} : vector<4x16x16xf32>, vector<4x16x8xf32>, vector<4x16x8xf32> -> vector<4x16x8xf32>
    "tpu.trace_stop"() : () -> ()
    %42 = vector.broadcast %40 : vector<4x16x1xf32> to vector<4x16x8xf32>
    %43 = arith.divf %41, %42 : vector<4x16x8xf32>
    %c0_21 = arith.constant 0 : index
    %c0_22 = arith.constant 0 : index
    %c0_23 = arith.constant 0 : index
    %c0_24 = arith.constant 0 : index
    %44 = vector.load %arg6[%c0_21, %c0_22, %c0_23, %c0_24] : memref<2x4x8x32xf32, #tpu.memory_space<vmem>>, vector<1x4x8x32xf32>
    %45 = vector.shape_cast %44 : vector<1x4x8x32xf32> to vector<4x8x32xf32>
    "tpu.trace_start"() <{level = 10 : i32, message = "hmd,hdk->hmk"}> : () -> ()
    %cst_25 = arith.constant dense<0.000000e+00> : vector<4x16x32xf32>
    %46 = tpu.matmul %43, %45, %cst_25 {dimension_numbers = #tpu.dot_dimension_numbers<[2], [1], [1], [2], [0, 0, 0, 1, 1, 2], [0], [0]>} : vector<4x16x8xf32>, vector<4x8x32xf32>, vector<4x16x32xf32> -> vector<4x16x32xf32>
    "tpu.trace_stop"() : () -> ()
    %cst_26 = arith.constant dense<0.000000e+00> : vector<16x32xf32>
    %47 = vector.multi_reduction <add>, %46, %cst_26 [0] : vector<4x16x32xf32> to vector<16x32xf32>
    %48 = arith.addf %7, %47 : vector<16x32xf32>
    %c0_27 = arith.constant 0 : index
    %c0_28 = arith.constant 0 : index
    %c0_29 = arith.constant 0 : index
    %49 = vector.load %arg7[%c0_27, %c0_28, %c0_29] : memref<2x1x32xf32, #tpu.memory_space<vmem>>, vector<1x1x32xf32>
    %50 = vector.shape_cast %49 : vector<1x1x32xf32> to vector<1x32xf32>
    %51 = arith.mulf %48, %48 : vector<16x32xf32>
    %cst_30 = arith.constant dense<0.000000e+00> : vector<16xf32>
    %52 = vector.multi_reduction <add>, %51, %cst_30 [1] : vector<16x32xf32> to vector<16xf32>
    %53 = vector.shape_cast %52 : vector<16xf32> to vector<16x1xf32>
    %cst_31 = arith.constant 3.200000e+01 : f32
    %54 = vector.broadcast %cst_31 : f32 to vector<16x1xf32>
    %55 = arith.divf %53, %54 : vector<16x1xf32>
    %cst_32 = arith.constant 9.99999997E-7 : f32
    %56 = vector.broadcast %cst_32 : f32 to vector<16x1xf32>
    %57 = arith.addf %55, %56 : vector<16x1xf32>
    %58 = math.rsqrt %57 : vector<16x1xf32>
    %59 = vector.broadcast %58 : vector<16x1xf32> to vector<16x32xf32>
    %60 = arith.mulf %48, %59 : vector<16x32xf32>
    %61 = vector.broadcast %50 : vector<1x32xf32> to vector<16x32xf32>
    %62 = arith.mulf %60, %61 : vector<16x32xf32>
    %c0_33 = arith.constant 0 : index
    %c0_34 = arith.constant 0 : index
    %c0_35 = arith.constant 0 : index
    %63 = vector.load %arg8[%c0_33, %c0_34, %c0_35] : memref<2x32x128xf32, #tpu.memory_space<vmem>>, vector<1x32x128xf32>
    %64 = vector.shape_cast %63 : vector<1x32x128xf32> to vector<32x128xf32>
    %cst_36 = arith.constant dense<0.000000e+00> : vector<16x128xf32>
    %65 = tpu.matmul %62, %64, %cst_36 {dimension_numbers = #tpu.dot_dimension_numbers<[1], [0], [0], [1], [0, 0, 1, 1], [], []>} : vector<16x32xf32>, vector<32x128xf32>, vector<16x128xf32> -> vector<16x128xf32>
    %66 = vector.extract_strided_slice %65 {offsets = [0, 0], sizes = [16, 64], strides = [1, 1]} : vector<16x128xf32> to vector<16x64xf32>
    %cst_37 = arith.constant 5.000000e-01 : f32
    %67 = vector.broadcast %cst_37 : f32 to vector<16x64xf32>
    %68 = arith.mulf %67, %66 : vector<16x64xf32>
    %cst_38 = arith.constant 4.471500e-02 : f32
    %69 = vector.broadcast %cst_38 : f32 to vector<16x64xf32>
    %70 = arith.mulf %69, %66 : vector<16x64xf32>
    %71 = arith.mulf %70, %66 : vector<16x64xf32>
    %72 = arith.mulf %71, %66 : vector<16x64xf32>
    %73 = arith.addf %66, %72 : vector<16x64xf32>
    %cst_39 = arith.constant 0.797884583 : f32
    %74 = vector.broadcast %cst_39 : f32 to vector<16x64xf32>
    %75 = arith.mulf %74, %73 : vector<16x64xf32>
    %76 = math.tanh %75 : vector<16x64xf32>
    %cst_40 = arith.constant 1.000000e+00 : f32
    %77 = vector.broadcast %cst_40 : f32 to vector<16x64xf32>
    %78 = arith.addf %77, %76 : vector<16x64xf32>
    %79 = arith.mulf %68, %78 : vector<16x64xf32>
    %80 = vector.extract_strided_slice %65 {offsets = [0, 64], sizes = [16, 64], strides = [1, 1]} : vector<16x128xf32> to vector<16x64xf32>
    %81 = arith.mulf %79, %80 : vector<16x64xf32>
    %c0_41 = arith.constant 0 : index
    %c0_42 = arith.constant 0 : index
    %c0_43 = arith.constant 0 : index
    %82 = vector.load %arg9[%c0_41, %c0_42, %c0_43] : memref<2x64x32xf32, #tpu.memory_space<vmem>>, vector<1x64x32xf32>
    %83 = vector.shape_cast %82 : vector<1x64x32xf32> to vector<64x32xf32>
    %cst_44 = arith.constant dense<0.000000e+00> : vector<16x32xf32>
    %84 = tpu.matmul %81, %83, %cst_44 {dimension_numbers = #tpu.dot_dimension_numbers<[1], [0], [0], [1], [0, 0, 1, 1], [], []>} : vector<16x64xf32>, vector<64x32xf32>, vector<16x32xf32> -> vector<16x32xf32>
    %85 = arith.addf %48, %84 : vector<16x32xf32>
    %c1 = arith.constant 1 : index
    %c0_45 = arith.constant 0 : index
    %c0_46 = arith.constant 0 : index
    %86 = vector.load %arg4[%c1, %c0_45, %c0_46] : memref<2x1x32xf32, #tpu.memory_space<vmem>>, vector<1x1x32xf32>
    %87 = vector.shape_cast %86 : vector<1x1x32xf32> to vector<1x32xf32>
    %88 = arith.mulf %85, %85 : vector<16x32xf32>
    %cst_47 = arith.constant dense<0.000000e+00> : vector<16xf32>
    %89 = vector.multi_reduction <add>, %88, %cst_47 [1] : vector<16x32xf32> to vector<16xf32>
    %90 = vector.shape_cast %89 : vector<16xf32> to vector<16x1xf32>
    %cst_48 = arith.constant 3.200000e+01 : f32
    %91 = vector.broadcast %cst_48 : f32 to vector<16x1xf32>
    %92 = arith.divf %90, %91 : vector<16x1xf32>
    %cst_49 = arith.constant 9.99999997E-7 : f32
    %93 = vector.broadcast %cst_49 : f32 to vector<16x1xf32>
    %94 = arith.addf %92, %93 : vector<16x1xf32>
    %95 = math.rsqrt %94 : vector<16x1xf32>
    %96 = vector.broadcast %95 : vector<16x1xf32> to vector<16x32xf32>
    %97 = arith.mulf %85, %96 : vector<16x32xf32>
    %98 = vector.broadcast %87 : vector<1x32xf32> to vector<16x32xf32>
    %99 = arith.mulf %97, %98 : vector<16x32xf32>
    %100 = vector.shape_cast %99 : vector<16x32xf32> to vector<1x16x32xf32>
    %101 = vector.shape_cast %100 : vector<1x16x32xf32> to vector<1x16x32xf32>
    %102 = vector.broadcast %101 : vector<1x16x32xf32> to vector<12x16x32xf32>
    %c1_50 = arith.constant 1 : index
    %c0_51 = arith.constant 0 : index
    %c0_52 = arith.constant 0 : index
    %c0_53 = arith.constant 0 : index
    %103 = vector.load %arg5[%c1_50, %c0_51, %c0_52, %c0_53] : memref<2x12x32x8xf32, #tpu.memory_space<vmem>>, vector<1x12x32x8xf32>
    %104 = vector.shape_cast %103 : vector<1x12x32x8xf32> to vector<12x32x8xf32>
    "tpu.trace_start"() <{level = 10 : i32, message = "hmd,hdk->hmk"}> : () -> ()
    %cst_54 = arith.constant dense<0.000000e+00> : vector<12x16x8xf32>
    %105 = tpu.matmul %102, %104, %cst_54 {dimension_numbers = #tpu.dot_dimension_numbers<[2], [1], [1], [2], [0, 0, 0, 1, 1, 2], [0], [0]>} : vector<12x16x32xf32>, vector<12x32x8xf32>, vector<12x16x8xf32> -> vector<12x16x8xf32>
    "tpu.trace_stop"() : () -> ()
    %106 = vector.extract_strided_slice %105 {offsets = [0, 0, 0], sizes = [4, 16, 8], strides = [1, 1, 1]} : vector<12x16x8xf32> to vector<4x16x8xf32>
    %107 = vector.extract_strided_slice %105 {offsets = [4, 0, 0], sizes = [4, 16, 8], strides = [1, 1, 1]} : vector<12x16x8xf32> to vector<4x16x8xf32>
    %108 = vector.extract_strided_slice %105 {offsets = [8, 0, 0], sizes = [4, 16, 8], strides = [1, 1, 1]} : vector<12x16x8xf32> to vector<4x16x8xf32>
    "tpu.trace_start"() <{level = 10 : i32, message = "hqd,hkd->hqk"}> : () -> ()
    %cst_55 = arith.constant dense<0.000000e+00> : vector<4x16x16xf32>
    %109 = tpu.matmul %106, %107, %cst_55 {dimension_numbers = #tpu.dot_dimension_numbers<[2], [2], [1], [1], [0, 0, 0, 1, 1, 1], [0], [0]>} : vector<4x16x8xf32>, vector<4x16x8xf32>, vector<4x16x16xf32> -> vector<4x16x16xf32>
    "tpu.trace_stop"() : () -> ()
    %110 = arith.addf %109, %8 : vector<4x16x16xf32>
    %cst_56 = arith.constant dense<0xFF800000> : vector<4x16xf32>
    %111 = vector.multi_reduction <maximumf>, %110, %cst_56 [2] : vector<4x16x16xf32> to vector<4x16xf32>
    %112 = vector.shape_cast %111 : vector<4x16xf32> to vector<4x16x1xf32>
    %113 = vector.broadcast %112 : vector<4x16x1xf32> to vector<4x16x16xf32>
    %114 = arith.subf %110, %113 : vector<4x16x16xf32>
    %115 = math.exp %114 : vector<4x16x16xf32>
    %cst_57 = arith.constant dense<0.000000e+00> : vector<4x16xf32>
    %116 = vector.multi_reduction <add>, %115, %cst_57 [2] : vector<4x16x16xf32> to vector<4x16xf32>
    %117 = vector.shape_cast %116 : vector<4x16xf32> to vector<4x16x1xf32>
    "tpu.trace_start"() <{level = 10 : i32, message = "hqk,hkd->hqd"}> : () -> ()
    %cst_58 = arith.constant dense<0.000000e+00> : vector<4x16x8xf32>
    %118 = tpu.matmul %115, %108, %cst_58 {dimension_numbers = #tpu.dot_dimension_numbers<[2], [1], [1], [2], [0, 0, 0, 1, 1, 2], [0], [0]>} : vector<4x16x16xf32>, vector<4x16x8xf32>, vector<4x16x8xf32> -> vector<4x16x8xf32>
    "tpu.trace_stop"() : () -> ()
    %119 = vector.broadcast %117 : vector<4x16x1xf32> to vector<4x16x8xf32>
    %120 = arith.divf %118, %119 : vector<4x16x8xf32>
    %c1_59 = arith.constant 1 : index
    %c0_60 = arith.constant 0 : index
    %c0_61 = arith.constant 0 : index
    %c0_62 = arith.constant 0 : index
    %121 = vector.load %arg6[%c1_59, %c0_60, %c0_61, %c0_62] : memref<2x4x8x32xf32, #tpu.memory_space<vmem>>, vector<1x4x8x32xf32>
    %122 = vector.shape_cast %121 : vector<1x4x8x32xf32> to vector<4x8x32xf32>
    "tpu.trace_start"() <{level = 10 : i32, message = "hmd,hdk->hmk"}> : () -> ()
    %cst_63 = arith.constant dense<0.000000e+00> : vector<4x16x32xf32>
    %123 = tpu.matmul %120, %122, %cst_63 {dimension_numbers = #tpu.dot_dimension_numbers<[2], [1], [1], [2], [0, 0, 0, 1, 1, 2], [0], [0]>} : vector<4x16x8xf32>, vector<4x8x32xf32>, vector<4x16x32xf32> -> vector<4x16x32xf32>
    "tpu.trace_stop"() : () -> ()
    %cst_64 = arith.constant dense<0.000000e+00> : vector<16x32xf32>
    %124 = vector.multi_reduction <add>, %123, %cst_64 [0] : vector<4x16x32xf32> to vector<16x32xf32>
    %125 = arith.addf %85, %124 : vector<16x32xf32>
    %c1_65 = arith.constant 1 : index
    %c0_66 = arith.constant 0 : index
    %c0_67 = arith.constant 0 : index
    %126 = vector.load %arg7[%c1_65, %c0_66, %c0_67] : memref<2x1x32xf32, #tpu.memory_space<vmem>>, vector<1x1x32xf32>
    %127 = vector.shape_cast %126 : vector<1x1x32xf32> to vector<1x32xf32>
    %128 = arith.mulf %125, %125 : vector<16x32xf32>
    %cst_68 = arith.constant dense<0.000000e+00> : vector<16xf32>
    %129 = vector.multi_reduction <add>, %128, %cst_68 [1] : vector<16x32xf32> to vector<16xf32>
    %130 = vector.shape_cast %129 : vector<16xf32> to vector<16x1xf32>
    %cst_69 = arith.constant 3.200000e+01 : f32
    %131 = vector.broadcast %cst_69 : f32 to vector<16x1xf32>
    %132 = arith.divf %130, %131 : vector<16x1xf32>
    %cst_70 = arith.constant 9.99999997E-7 : f32
    %133 = vector.broadcast %cst_70 : f32 to vector<16x1xf32>
    %134 = arith.addf %132, %133 : vector<16x1xf32>
    %135 = math.rsqrt %134 : vector<16x1xf32>
    %136 = vector.broadcast %135 : vector<16x1xf32> to vector<16x32xf32>
    %137 = arith.mulf %125, %136 : vector<16x32xf32>
    %138 = vector.broadcast %127 : vector<1x32xf32> to vector<16x32xf32>
    %139 = arith.mulf %137, %138 : vector<16x32xf32>
    %c1_71 = arith.constant 1 : index
    %c0_72 = arith.constant 0 : index
    %c0_73 = arith.constant 0 : index
    %140 = vector.load %arg8[%c1_71, %c0_72, %c0_73] : memref<2x32x128xf32, #tpu.memory_space<vmem>>, vector<1x32x128xf32>
    %141 = vector.shape_cast %140 : vector<1x32x128xf32> to vector<32x128xf32>
    %cst_74 = arith.constant dense<0.000000e+00> : vector<16x128xf32>
    %142 = tpu.matmul %139, %141, %cst_74 {dimension_numbers = #tpu.dot_dimension_numbers<[1], [0], [0], [1], [0, 0, 1, 1], [], []>} : vector<16x32xf32>, vector<32x128xf32>, vector<16x128xf32> -> vector<16x128xf32>
    %143 = vector.extract_strided_slice %142 {offsets = [0, 0], sizes = [16, 64], strides = [1, 1]} : vector<16x128xf32> to vector<16x64xf32>
    %cst_75 = arith.constant 5.000000e-01 : f32
    %144 = vector.broadcast %cst_75 : f32 to vector<16x64xf32>
    %145 = arith.mulf %144, %143 : vector<16x64xf32>
    %cst_76 = arith.constant 4.471500e-02 : f32
    %146 = vector.broadcast %cst_76 : f32 to vector<16x64xf32>
    %147 = arith.mulf %146, %143 : vector<16x64xf32>
    %148 = arith.mulf %147, %143 : vector<16x64xf32>
    %149 = arith.mulf %148, %143 : vector<16x64xf32>
    %150 = arith.addf %143, %149 : vector<16x64xf32>
    %cst_77 = arith.constant 0.797884583 : f32
    %151 = vector.broadcast %cst_77 : f32 to vector<16x64xf32>
    %152 = arith.mulf %151, %150 : vector<16x64xf32>
    %153 = math.tanh %152 : vector<16x64xf32>
    %cst_78 = arith.constant 1.000000e+00 : f32
    %154 = vector.broadcast %cst_78 : f32 to vector<16x64xf32>
    %155 = arith.addf %154, %153 : vector<16x64xf32>
    %156 = arith.mulf %145, %155 : vector<16x64xf32>
    %157 = vector.extract_strided_slice %142 {offsets = [0, 64], sizes = [16, 64], strides = [1, 1]} : vector<16x128xf32> to vector<16x64xf32>
    %158 = arith.mulf %156, %157 : vector<16x64xf32>
    %c1_79 = arith.constant 1 : index
    %c0_80 = arith.constant 0 : index
    %c0_81 = arith.constant 0 : index
    %159 = vector.load %arg9[%c1_79, %c0_80, %c0_81] : memref<2x64x32xf32, #tpu.memory_space<vmem>>, vector<1x64x32xf32>
    %160 = vector.shape_cast %159 : vector<1x64x32xf32> to vector<64x32xf32>
    %cst_82 = arith.constant dense<0.000000e+00> : vector<16x32xf32>
    %161 = tpu.matmul %158, %160, %cst_82 {dimension_numbers = #tpu.dot_dimension_numbers<[1], [0], [0], [1], [0, 0, 1, 1], [], []>} : vector<16x64xf32>, vector<64x32xf32>, vector<16x32xf32> -> vector<16x32xf32>
    %162 = arith.addf %125, %161 : vector<16x32xf32>
    %c0_83 = arith.constant 0 : index
    %c0_84 = arith.constant 0 : index
    %163 = vector.load %arg10[%c0_83, %c0_84] : memref<1x32xf32, #tpu.memory_space<vmem>>, vector<1x32xf32>
    %164 = arith.mulf %162, %162 : vector<16x32xf32>
    %cst_85 = arith.constant dense<0.000000e+00> : vector<16xf32>
    %165 = vector.multi_reduction <add>, %164, %cst_85 [1] : vector<16x32xf32> to vector<16xf32>
    %166 = vector.shape_cast %165 : vector<16xf32> to vector<16x1xf32>
    %cst_86 = arith.constant 3.200000e+01 : f32
    %167 = vector.broadcast %cst_86 : f32 to vector<16x1xf32>
    %168 = arith.divf %166, %167 : vector<16x1xf32>
    %cst_87 = arith.constant 9.99999997E-7 : f32
    %169 = vector.broadcast %cst_87 : f32 to vector<16x1xf32>
    %170 = arith.addf %168, %169 : vector<16x1xf32>
    %171 = math.rsqrt %170 : vector<16x1xf32>
    %172 = vector.broadcast %171 : vector<16x1xf32> to vector<16x32xf32>
    %173 = arith.mulf %162, %172 : vector<16x32xf32>
    %174 = vector.broadcast %163 : vector<1x32xf32> to vector<16x32xf32>
    %175 = arith.mulf %173, %174 : vector<16x32xf32>
    %c0_88 = arith.constant 0 : index
    %c0_89 = arith.constant 0 : index
    %176 = vector.load %arg3[%c0_88, %c0_89] : memref<2x16xf32, #tpu.memory_space<vmem>>, vector<2x16xf32>
    %cst_90 = arith.constant dense<0.000000e+00> : vector<2x32xf32>
    %177 = tpu.matmul %176, %175, %cst_90 {dimension_numbers = #tpu.dot_dimension_numbers<[1], [0], [0], [1], [0, 0, 1, 1], [], []>} : vector<2x16xf32>, vector<16x32xf32>, vector<2x32xf32> -> vector<2x32xf32>
    %c0_91 = arith.constant 0 : index
    %c0_92 = arith.constant 0 : index
    %178 = vector.load %arg11[%c0_91, %c0_92] : memref<2x32xf32, #tpu.memory_space<vmem>>, vector<2x32xf32>
    tpu.vector_store %arg11[%c0_91, %c0_92], %177 {strides = array<i32>} : memref<2x32xf32, #tpu.memory_space<vmem>>, vector<2x32xf32>,
    return
  }
}

</mosaic_0001>

<bundles_post_ra>
// kernel: tile.9
= control target key start
LH: loop header
LB: loop body
LE: loop exit
PB: predicated region body
PF: predicated region fallthrough
CT: control target
= control target key end

     0   :  { %vm323_vm0 = vcmask 1047556   ;;  %s617_s10 = smov 8   ;;  %vm325_vm1 = vcmask 64512   ;;  %vm398_vm2 = vcmask 130112   ;;  %s908_s0 = inlined_call_operand.vmem [shape: f32[4,2,8,2,8], index: 0, kind: input, shape index: {}]   ;;  %s909_s1 = inlined_call_operand.vmem [shape: f32[4,16,16], index: 1, kind: output, shape index: {}]  }
   0x1   :  { %v595_v0 = vld [vmem:[%s908_s0 + $0xe] sm:$0x3]  ;;  %v596_v1 = vld [vmem:[%s908_s0 + $0xc] sm:$0x3]  ;;  %v597_v2 = vld [vmem:[%s908_s0 + $0xa] sm:$0x3] }
   0x2   :  { %289 = vst [vmem:[#allocation0 + $0x38] sm:$0x3] %v595_v0  ;;  %294 = vst [vmem:[#allocation0 + $0x30] sm:$0x3] %v596_v1  ;;  %v598_v3 = vld [vmem:[%s908_s0 + $0x8] sm:$0x3] }
   0x3   :  { %299 = vst [vmem:[#allocation0 + $0x28] sm:$0x3] %v597_v2  ;;  %v599_v4 = vld [vmem:[%s908_s0 + $0x6] sm:$0x3]  ;;  %v600_v5 = vld [vmem:[%s908_s0 + $0x4] sm:$0x3] }
   0x4   :  { %304 = vst [vmem:[#allocation0 + $0x20] sm:$0x3] %v598_v3  ;;  %309 = vst [vmem:[#allocation0 + $0x18] sm:$0x3] %v599_v4  ;;  %v601_v6 = vld [vmem:[%s908_s0 + $0x2] sm:$0x3] }
   0x5   :  { %314 = vst [vmem:[#allocation0 + $0x10] sm:$0x3] %v600_v5  ;;  %v319_v7 = vld [vmem:[%s908_s0] sm:$0x3]  ;;  %318 = vst [vmem:[#allocation0 + $0x8] sm:$0x3] %v601_v6 }
   0x6   :  { %320 = vst [vmem:[#allocation0] sm:$0x3] %v319_v7  ;;  %v587_v8 = vld [vmem:[%s908_s0 + $0x1e] sm:$0x3]  ;;  %v588_v9 = vld [vmem:[%s908_s0 + $0x1c] sm:$0x3] }
   0x7   :  { %v589_v10 = vld [vmem:[%s908_s0 + $0x1a] sm:$0x3]  ;;  %249 = vst [vmem:[#allocation0 + $0x78] sm:$0x3] %v587_v8  ;;  %254 = vst [vmem:[#allocation0 + $0x70] sm:$0x3] %v588_v9 }
   0x8   :  { %259 = vst [vmem:[#allocation0 + $0x68] sm:$0x3] %v589_v10  ;;  %v590_v11 = vld [vmem:[%s908_s0 + $0x18] sm:$0x3]  ;;  %v591_v12 = vld [vmem:[%s908_s0 + $0x16] sm:$0x3] }
   0x9   :  { %v592_v13 = vld [vmem:[%s908_s0 + $0x14] sm:$0x3]  ;;  %264 = vst [vmem:[#allocation0 + $0x60] sm:$0x3] %v590_v11  ;;  %269 = vst [vmem:[#allocation0 + $0x58] sm:$0x3] %v591_v12 }
   0xa   :  { %274 = vst [vmem:[#allocation0 + $0x50] sm:$0x3] %v592_v13  ;;  %v593_v14 = vld [vmem:[%s908_s0 + $0x12] sm:$0x3]  ;;  %v594_v15 = vld [vmem:[%s908_s0 + $0x10] sm:$0x3] }
   0xb   :  { %v563_v16 = vld [vmem:[%s908_s0 + $0x4e] sm:$0x3]  ;;  %279 = vst [vmem:[#allocation0 + $0x48] sm:$0x3] %v593_v14  ;;  %284 = vst [vmem:[#allocation0 + $0x40] sm:$0x3] %v594_v15 }
   0xc   :  { %129 = vst [vmem:[#allocation0 + $0x138] sm:$0x3] %v563_v16  ;;  %v564_v17 = vld [vmem:[%s908_s0 + $0x4c] sm:$0x3]  ;;  %v565_v18 = vld [vmem:[%s908_s0 + $0x4a] sm:$0x3] }
   0xd   :  { %v566_v19 = vld [vmem:[%s908_s0 + $0x48] sm:$0x3]  ;;  %134 = vst [vmem:[#allocation0 + $0x130] sm:$0x3] %v564_v17  ;;  %139 = vst [vmem:[#allocation0 + $0x128] sm:$0x3] %v565_v18 }
   0xe   :  { %144 = vst [vmem:[#allocation0 + $0x120] sm:$0x3] %v566_v19  ;;  %v567_v20 = vld [vmem:[%s908_s0 + $0x46] sm:$0x3]  ;;  %v568_v21 = vld [vmem:[%s908_s0 + $0x44] sm:$0x3] }
   0xf   :  { %v569_v22 = vld [vmem:[%s908_s0 + $0x42] sm:$0x3]  ;;  %149 = vst [vmem:[#allocation0 + $0x118] sm:$0x3] %v567_v20  ;;  %154 = vst [vmem:[#allocation0 + $0x110] sm:$0x3] %v568_v21 }
  0x10   :  { %159 = vst [vmem:[#allocation0 + $0x108] sm:$0x3] %v569_v22  ;;  %v570_v23 = vld [vmem:[%s908_s0 + $0x40] sm:$0x3]  ;;  %v555_v24 = vld [vmem:[%s908_s0 + $0x5e] sm:$0x3] }
  0x11   :  { %v556_v25 = vld [vmem:[%s908_s0 + $0x5c] sm:$0x3]  ;;  %v393_v26 = vld [vmem:[#allocation0 + $0x1] ss:$8 sm:$0xf0]  }
  0x12   :  { %164 = vst [vmem:[#allocation0 + $0x100] sm:$0x3] %v570_v23  ;;  %89 = vst [vmem:[#allocation0 + $0x178] sm:$0x3] %v555_v24  ;;  %v557_v27 = vld [vmem:[%s908_s0 + $0x5a] sm:$0x3] }
  0x13   :  { %94 = vst [vmem:[#allocation0 + $0x170] sm:$0x3] %v556_v25  ;;  %v391_v28 = vld [vmem:[#allocation0 + $0x1] ss:$8 sm:$0xf]  }
  0x14   :  { %99 = vst [vmem:[#allocation0 + $0x168] sm:$0x3] %v557_v27  ;;  %v558_v29 = vld [vmem:[%s908_s0 + $0x58] sm:$0x3]  ;;  %v395_v30 = vsel %vm323_vm0, %v393_v26, %v391_v28  ;;  %v559_v31 = vld [vmem:[%s908_s0 + $0x56] sm:$0x3] }
  0x15   :  { %104 = vst [vmem:[#allocation0 + $0x160] sm:$0x3] %v558_v29  ;;  %v560_v32 = vld [vmem:[%s908_s0 + $0x54] sm:$0x3]  ;;  %v561_v33 = vld [vmem:[%s908_s0 + $0x52] sm:$0x3]  ;;  %396 = vrot.lane.b32.xlu0 %v395_v30, %s617_s10 }
  0x16   :  { %v414_v34 = vld [vmem:[#allocation0 + $0x41] ss:$8 sm:$0xf0]   ;;  %109 = vst [vmem:[#allocation0 + $0x158] sm:$0x3] %v559_v31 }
  0x17   :  { %114 = vst [vmem:[#allocation0 + $0x150] sm:$0x3] %v560_v32  ;;  %119 = vst [vmem:[#allocation0 + $0x148] sm:$0x3] %v561_v33  ;;  %v562_v35 = vld [vmem:[%s908_s0 + $0x50] sm:$0x3] }
  0x18   :  { %v412_v36 = vld [vmem:[#allocation0 + $0x41] ss:$8 sm:$0xf]   ;;  %124 = vst [vmem:[#allocation0 + $0x140] sm:$0x3] %v562_v35 }
  0x19   :  { %v579_v37 = vld [vmem:[%s908_s0 + $0x2e] sm:$0x3]  ;;  %v416_v38 = vsel %vm323_vm0, %v414_v34, %v412_v36  ;;  %v403_v39 = vld [vmem:[#allocation0 + $0x101] ss:$8 sm:$0xf0]  }
  0x1a   :  { %209 = vst [vmem:[#allocation0 + $0xb8] sm:$0x3] %v579_v37  ;;  %v580_v40 = vld [vmem:[%s908_s0 + $0x2c] sm:$0x3]  ;;  %417 = vrot.lane.b32.xlu1 %v416_v38, %s617_s10  ;;  %v581_v41 = vld [vmem:[%s908_s0 + $0x2a] sm:$0x3] }
  0x1b   :  { %214 = vst [vmem:[#allocation0 + $0xb0] sm:$0x3] %v580_v40  ;;  %v582_v42 = vld [vmem:[%s908_s0 + $0x28] sm:$0x3]  ;;  %v583_v43 = vld [vmem:[%s908_s0 + $0x26] sm:$0x3] }
  0x1c   :  { %v401_v44 = vld [vmem:[#allocation0 + $0x101] ss:$8 sm:$0xf]   ;;  %219 = vst [vmem:[#allocation0 + $0xa8] sm:$0x3] %v581_v41 }
  0x1d   :  { %224 = vst [vmem:[#allocation0 + $0xa0] sm:$0x3] %v582_v42  ;;  %229 = vst [vmem:[#allocation0 + $0x98] sm:$0x3] %v583_v43  ;;  %v584_v45 = vld [vmem:[%s908_s0 + $0x24] sm:$0x3]  ;;  %v405_v46 = vsel %vm323_vm0, %v403_v39, %v401_v44 }
  0x1e   :  { %234 = vst [vmem:[#allocation0 + $0x90] sm:$0x3] %v584_v45  ;;  %v585_v47 = vld [vmem:[%s908_s0 + $0x22] sm:$0x3]  ;;  %v586_v48 = vld [vmem:[%s908_s0 + $0x20] sm:$0x3]  ;;  %406 = vrot.lane.b32.xlu0 %v405_v46, %s617_s10 }
  0x1f   :  { %v547_v49 = vld [vmem:[%s908_s0 + $0x6e] sm:$0x3]  ;;  %v425_v50 = vld [vmem:[#allocation0 + $0x141] ss:$8 sm:$0xf0]  }
  0x20   :  { %239 = vst [vmem:[#allocation0 + $0x88] sm:$0x3] %v585_v47  ;;  %244 = vst [vmem:[#allocation0 + $0x80] sm:$0x3] %v586_v48  ;;  %v548_v51 = vld [vmem:[%s908_s0 + $0x6c] sm:$0x3] }
  0x21   :  { %49 = vst [vmem:[#allocation0 + $0x1b8] sm:$0x3] %v547_v49  ;;  %54 = vst [vmem:[#allocation0 + $0x1b0] sm:$0x3] %v548_v51  ;;  %v549_v52 = vld [vmem:[%s908_s0 + $0x6a] sm:$0x3] }
  0x22   :  { %v550_v53 = vld [vmem:[%s908_s0 + $0x68] sm:$0x3]  ;;  %v551_v54 = vld [vmem:[%s908_s0 + $0x66] sm:$0x3]  ;;  %59 = vst [vmem:[#allocation0 + $0x1a8] sm:$0x3] %v549_v52 }
  0x23   :  { %v423_v55 = vld [vmem:[#allocation0 + $0x141] ss:$8 sm:$0xf]   ;;  %64 = vst [vmem:[#allocation0 + $0x1a0] sm:$0x3] %v550_v53 }
  0x24   :  { %69 = vst [vmem:[#allocation0 + $0x198] sm:$0x3] %v551_v54  ;;  %v552_v56 = vld [vmem:[%s908_s0 + $0x64] sm:$0x3]  ;;  %v427_v57 = vsel %vm323_vm0, %v425_v50, %v423_v55  ;;  %v553_v58 = vld [vmem:[%s908_s0 + $0x62] sm:$0x3] }
  0x25   :  { %74 = vst [vmem:[#allocation0 + $0x190] sm:$0x3] %v552_v56  ;;  %v554_v59 = vld [vmem:[%s908_s0 + $0x60] sm:$0x3]  ;;  %v571_v60 = vld [vmem:[%s908_s0 + $0x3e] sm:$0x3]  ;;  %428 = vrot.lane.b32.xlu1 %v427_v57, %s617_s10 }
  0x26   :  { %79 = vst [vmem:[#allocation0 + $0x188] sm:$0x3] %v553_v58  ;;  %84 = vst [vmem:[#allocation0 + $0x180] sm:$0x3] %v554_v59  ;;  %v572_v61 = vld [vmem:[%s908_s0 + $0x3c] sm:$0x3] }
  0x27   :  { %169 = vst [vmem:[#allocation0 + $0xf8] sm:$0x3] %v571_v60  ;;  %v573_v62 = vld [vmem:[%s908_s0 + $0x3a] sm:$0x3]  ;;  %v574_v63 = vld [vmem:[%s908_s0 + $0x38] sm:$0x3] }
  0x28   :  { %v436_v0 = vld [vmem:[#allocation0 + $0x81] ss:$8 sm:$0xf0]   ;;  %174 = vst [vmem:[#allocation0 + $0xf0] sm:$0x3] %v572_v61 }
  0x29   :  { %179 = vst [vmem:[#allocation0 + $0xe8] sm:$0x3] %v573_v62  ;;  %184 = vst [vmem:[#allocation0 + $0xe0] sm:$0x3] %v574_v63  ;;  %v575_v1 = vld [vmem:[%s908_s0 + $0x36] sm:$0x3] }
  0x2a   :  { %189 = vst [vmem:[#allocation0 + $0xd8] sm:$0x3] %v575_v1  ;;  %v576_v2 = vld [vmem:[%s908_s0 + $0x34] sm:$0x3]  ;;  %v577_v3 = vld [vmem:[%s908_s0 + $0x32] sm:$0x3] }
  0x2b   :  { %v578_v4 = vld [vmem:[%s908_s0 + $0x30] sm:$0x3]  ;;  %194 = vst [vmem:[#allocation0 + $0xd0] sm:$0x3] %v576_v2  ;;  %199 = vst [vmem:[#allocation0 + $0xc8] sm:$0x3] %v577_v3 }
  0x2c   :  { %v434_v5 = vld [vmem:[#allocation0 + $0x81] ss:$8 sm:$0xf]   ;;  %204 = vst [vmem:[#allocation0 + $0xc0] sm:$0x3] %v578_v4 }
  0x2d   :  { %v539_v6 = vld [vmem:[%s908_s0 + $0x7e] sm:$0x3]  ;;  %v438_v7 = vsel %vm323_vm0, %v436_v0, %v434_v5  ;;  %v540_v8 = vld [vmem:[%s908_s0 + $0x7c] sm:$0x3]  ;;  %v541_v9 = vld [vmem:[%s908_s0 + $0x7a] sm:$0x3] }
  0x2e   :  { %9 = vst [vmem:[#allocation0 + $0x1f8] sm:$0x3] %v539_v6  ;;  %v542_v10 = vld [vmem:[%s908_s0 + $0x78] sm:$0x3]  ;;  %439 = vrot.lane.b32.xlu0 %v438_v7, %s617_s10  ;;  %14 = vst [vmem:[#allocation0 + $0x1f0] sm:$0x3] %v540_v8 }
  0x2f   :  { %v447_v11 = vld [vmem:[#allocation0 + $0x181] ss:$8 sm:$0xf0]   ;;  %19 = vst [vmem:[#allocation0 + $0x1e8] sm:$0x3] %v541_v9 }
  0x30   :  { %24 = vst [vmem:[#allocation0 + $0x1e0] sm:$0x3] %v542_v10  ;;  %v543_v12 = vld [vmem:[%s908_s0 + $0x76] sm:$0x3]  ;;  %v544_v13 = vld [vmem:[%s908_s0 + $0x74] sm:$0x3] }
  0x31   :  { %29 = vst [vmem:[#allocation0 + $0x1d8] sm:$0x3] %v543_v12  ;;  %v545_v14 = vld [vmem:[%s908_s0 + $0x72] sm:$0x3]  ;;  %v546_v15 = vld [vmem:[%s908_s0 + $0x70] sm:$0x3] }
  0x32   :  { %v445_v16 = vld [vmem:[#allocation0 + $0x181] ss:$8 sm:$0xf]   ;;  %34 = vst [vmem:[#allocation0 + $0x1d0] sm:$0x3] %v544_v13 }
  0x33   :  { %39 = vst [vmem:[#allocation0 + $0x1c8] sm:$0x3] %v545_v14  ;;  %44 = vst [vmem:[#allocation0 + $0x1c0] sm:$0x3] %v546_v15  ;;  %v449_v18 = vsel %vm323_vm0, %v447_v11, %v445_v16 }
  0x34   :  { %v321_v17 = vld [vmem:[#allocation0] ss:$8 sm:$0xf]   ;;  %v458_v19 = vld [vmem:[#allocation0 + $0xc1] ss:$8 sm:$0xf0]   ;;  %450 = vrot.lane.b32.xlu1 %v449_v18, %s617_s10 }
  0x35   :  { %v322_v20 = vld [vmem:[#allocation0] ss:$8 sm:$0xf0]   ;;  %v456_v24 = vld [vmem:[#allocation0 + $0xc1] ss:$8 sm:$0xf]  }
  0x36   :  { %v324_v21 = vsel %vm323_vm0, %v322_v20, %v321_v17  ;;  %v328_v22 = vld [vmem:[#allocation0 + $0x40] ss:$8 sm:$0xf]   ;;  %v460_v27 = vsel %vm323_vm0, %v458_v19, %v456_v24 }
  0x37   :  { %v330_v23 = vld [vmem:[#allocation0 + $0x40] ss:$8 sm:$0xf0]   ;;  %326 = vst.msk [vmem:[%s909_s1] sm:$0xff] %vm325_vm1, %v324_v21   ;;  %461 = vrot.lane.b32.xlu0 %v460_v27, %s617_s10 }
  0x38   :  { %v332_v25 = vsel %vm323_vm0, %v330_v23, %v328_v22  ;;  %v355_v26 = vld [vmem:[#allocation0 + $0x100] ss:$8 sm:$0xf]   ;;  %v469_v30 = vld [vmem:[#allocation0 + $0x1c1] ss:$8 sm:$0xf0]  }
  0x39   :  { %602 = vst.msk [vmem:[%s909_s1 + $0x8] sm:$0xff] %vm325_vm1, %v332_v25   ;;  %v357_v28 = vld [vmem:[#allocation0 + $0x100] ss:$8 sm:$0xf0]  }
  0x3a   :  { %v364_v29 = vld [vmem:[#allocation0 + $0x140] ss:$8 sm:$0xf]   ;;  %v359_v31 = vsel %vm323_vm0, %v357_v28, %v355_v26  ;;  %v467_v36 = vld [vmem:[#allocation0 + $0x1c1] ss:$8 sm:$0xf]  }
  0x3b   :  { %v366_v32 = vld [vmem:[#allocation0 + $0x140] ss:$8 sm:$0xf0]   ;;  %605 = vst.msk [vmem:[%s909_s1 + $0x20] sm:$0xff] %vm325_vm1, %v359_v31   ;;  %v471_v39 = vsel %vm323_vm0, %v469_v30, %v467_v36 }
  0x3c   :  { %v368_v33 = vsel %vm323_vm0, %v366_v32, %v364_v29  ;;  %v337_v34 = vld [vmem:[#allocation0 + $0x80] ss:$8 sm:$0xf]   ;;  %472 = vrot.lane.b32.xlu1 %v471_v39, %s617_s10 }
  0x3d   :  { %v339_v35 = vld [vmem:[#allocation0 + $0x80] ss:$8 sm:$0xf0]   ;;  %606 = vst.msk [vmem:[%s909_s1 + $0x28] sm:$0xff] %vm325_vm1, %v368_v33  }
  0x3e   :  { %v341_v37 = vsel %vm323_vm0, %v339_v35, %v337_v34  ;;  %v373_v38 = vld [vmem:[#allocation0 + $0x180] ss:$8 sm:$0xf]  }
  0x3f   :  { %603 = vst.msk [vmem:[%s909_s1 + $0x10] sm:$0xff] %vm325_vm1, %v341_v37   ;;  %v375_v40 = vld [vmem:[#allocation0 + $0x180] ss:$8 sm:$0xf0]  }
  0x40   :  { %v346_v41 = vld [vmem:[#allocation0 + $0xc0] ss:$8 sm:$0xf]   ;;  %v377_v42 = vsel %vm323_vm0, %v375_v40, %v373_v38 }
  0x41   :  { %v348_v43 = vld [vmem:[#allocation0 + $0xc0] ss:$8 sm:$0xf0]   ;;  %607 = vst.msk [vmem:[%s909_s1 + $0x30] sm:$0xff] %vm325_vm1, %v377_v42  }
  0x42   :  { %v382_v44 = vld [vmem:[#allocation0 + $0x1c0] ss:$8 sm:$0xf]   ;;  %v350_v45 = vsel %vm323_vm0, %v348_v43, %v346_v41 }
  0x43   :  { %v384_v46 = vld [vmem:[#allocation0 + $0x1c0] ss:$8 sm:$0xf0]   ;;  %604 = vst.msk [vmem:[%s909_s1 + $0x18] sm:$0xff] %vm325_vm1, %v350_v45  }
  0x44   :  { %v386_v47 = vsel %vm323_vm0, %v384_v46, %v382_v44 }
  0x45   :  { %608 = vst.msk [vmem:[%s909_s1 + $0x38] sm:$0xff] %vm325_vm1, %v386_v47  }
  0x87   :  { %v397_v48 = vpop.permute.xlu0 %396  }
  0x88   :  { %399 = vst.msk [vmem:[%s909_s1] sm:$0xff] %vm398_vm2, %v397_v48  }
  0x8c   :  { %v418_v49 = vpop.permute.xlu1 %417  }
  0x8d   :  { %610 = vst.msk [vmem:[%s909_s1 + $0x8] sm:$0xff] %vm398_vm2, %v418_v49  }
  0x90   :  { %v407_v50 = vpop.permute.xlu0 %406  }
  0x91   :  { %609 = vst.msk [vmem:[%s909_s1 + $0x20] sm:$0xff] %vm398_vm2, %v407_v50  }
  0x97   :  { %v429_v51 = vpop.permute.xlu1 %428  }
  0x98   :  { %611 = vst.msk [vmem:[%s909_s1 + $0x28] sm:$0xff] %vm398_vm2, %v429_v51  }
  0xa0   :  { %v440_v52 = vpop.permute.xlu0 %439  }
  0xa1   :  { %612 = vst.msk [vmem:[%s909_s1 + $0x10] sm:$0xff] %vm398_vm2, %v440_v52  }
  0xa6   :  { %v451_v53 = vpop.permute.xlu1 %450  }
  0xa7   :  { %613 = vst.msk [vmem:[%s909_s1 + $0x30] sm:$0xff] %vm398_vm2, %v451_v53  }
  0xa9   :  { %v462_v54 = vpop.permute.xlu0 %461  }
  0xaa   :  { %614 = vst.msk [vmem:[%s909_s1 + $0x18] sm:$0xff] %vm398_vm2, %v462_v54  }
  0xae   :  { %v473_v55 = vpop.permute.xlu1 %472  }
  0xaf   :  { %615 = vst.msk [vmem:[%s909_s1 + $0x38] sm:$0xff] %vm398_vm2, %v473_v55  }

// kernel: byt5_embedder_forward.1
= control target key start
LH: loop header
LB: loop body
LE: loop exit
PB: predicated region body
PF: predicated region fallthrough
CT: control target
= control target key end

     0   :  { %v6199_v2 = vmov 0   ;;  %s7203_s0 = inlined_call_operand.vmem [shape: s32[16,1], index: 0, kind: input, shape index: {}]   ;;  %s7204_s1 = inlined_call_operand.vmem [shape: f32[384,32], index: 1, kind: input, shape index: {}]   ;;  %s7205_s2 = inlined_call_operand.vmem [shape: f32[4,16,16], index: 2, kind: input, shape index: {}]   ;;  %s7206_s3 = inlined_call_operand.vmem [shape: f32[2,16], index: 3, kind: input, shape index: {}]   ;;  %s7207_s4 = inlined_call_operand.vmem [shape: f32[2,1,32], index: 4, kind: input, shape index: {}]   ;;  %s7208_s5 = inlined_call_operand.vmem [shape: f32[2,12,32,8], index: 5, kind: input, shape index: {}]   ;;  %s7209_s6 = inlined_call_operand.vmem [shape: f32[2,4,8,32], index: 6, kind: input, shape index: {}]   ;;  %s7210_s7 = inlined_call_operand.vmem [shape: f32[2,1,32], index: 7, kind: input, shape index: {}]   ;;  %s7211_s8 = inlined_call_operand.vmem [shape: f32[2,32,128], index: 8, kind: input, shape index: {}]   ;;  %s7212_s9 = inlined_call_operand.vmem [shape: f32[2,64,32], index: 9, kind: input, shape index: {}]   ;;  %s7213_s10 = inlined_call_operand.vmem [shape: f32[1,32], index: 10, kind: input, shape index: {}]   ;;  %s7214_s11 = inlined_call_operand.hbm [shape: f32[2,32], index: 11, kind: output, shape index: {}]  }
   0x1   :  { %v39_v0 = vld [vmem:[%s7203_s0] sm:$0xff]  ;;  %v100_v1 = vld [vmem:[%s7204_s1 + $0xf8] sm:$0xff]  ;;  %6076 = vset.pattern.permute.xlu0 %v6199_v2  ;;  %v99_v4 = vld [vmem:[%s7204_s1 + $0xf0] sm:$0xff] }
   0x2   :  { %5229 = vmatprep.subr.mxu0 %v100_v1  ;;  %v84_v3 = vld [vmem:[%s7204_s1 + $0x78] sm:$0xff]  ;;  %v83_v5 = vld [vmem:[%s7204_s1 + $0x70] sm:$0xff]  ;;  %46 = vperm.xlu0 %6076, %v39_v0   ;;  %v98_v7 = vld [vmem:[%s7204_s1 + $0xe8] sm:$0xff] }
   0x3   :  { %5230 = vmatpush3.msra.mxu0 %v84_v3  ;;  %v116_v6 = vld [vmem:[%s7204_s1 + $0x178] sm:$0xff]  ;;  %v40_v8 = vld [vmem:[%s7203_s0 + $0x8] sm:$0xff]  ;;  %v115_v10 = vld [vmem:[%s7204_s1 + $0x170] sm:$0xff] }
   0x4   :  { %5231 = vmatprep.subr.mxu0 %v99_v4  ;;  %5552 = vmatprep.subr.mxu1 %v116_v6  ;;  %v82_v9 = vld [vmem:[%s7204_s1 + $0x68] sm:$0xff]  ;;  %v97_v11 = vld [vmem:[%s7204_s1 + $0xe0] sm:$0xff]  ;;  %v96_v14 = vld [vmem:[%s7204_s1 + $0xd8] sm:$0xff] }
   0x5   :  { %5232 = vmatpush3.msra.mxu0 %v83_v5  ;;  %5553 = vmatpush3.msra.mxu1 %v116_v6  ;;  %v81_v12 = vld [vmem:[%s7204_s1 + $0x60] sm:$0xff]  ;;  %v114_v13 = vld [vmem:[%s7204_s1 + $0x168] sm:$0xff]  ;;  %v80_v15 = vld [vmem:[%s7204_s1 + $0x58] sm:$0xff] }
   0x6   :  { %5233 = vmatprep.subr.mxu0 %v98_v7  ;;  %5554 = vmatprep.subr.mxu1 %v115_v10  ;;  %v113_v16 = vld [vmem:[%s7204_s1 + $0x160] sm:$0xff]  ;;  %v95_v17 = vld [vmem:[%s7204_s1 + $0xd0] sm:$0xff]  ;;  %v112_v19 = vld [vmem:[%s7204_s1 + $0x158] sm:$0xff] }
   0x7   :  { %49 = vperm.xlu0 %6076, %v40_v8   ;;  %5234 = vmatpush3.msra.mxu0 %v82_v9  ;;  %v79_v18 = vld [vmem:[%s7204_s1 + $0x50] sm:$0xff]  ;;  %v94_v20 = vld [vmem:[%s7204_s1 + $0xc8] sm:$0xff]  ;;  %v93_v23 = vld [vmem:[%s7204_s1 + $0xc0] sm:$0xff] }
   0x8   :  { %5235 = vmatprep.subr.mxu0 %v97_v11  ;;  %5555 = vmatpush3.msra.mxu1 %v115_v10  ;;  %v78_v21 = vld [vmem:[%s7204_s1 + $0x48] sm:$0xff]  ;;  %v111_v22 = vld [vmem:[%s7204_s1 + $0x150] sm:$0xff]  ;;  %v77_v24 = vld [vmem:[%s7204_s1 + $0x40] sm:$0xff] }
   0x9   :  { %5236 = vmatpush3.msra.mxu0 %v81_v12  ;;  %5556 = vmatprep.subr.mxu1 %v114_v13  ;;  %v110_v25 = vld [vmem:[%s7204_s1 + $0x148] sm:$0xff]  ;;  %v92_v26 = vld [vmem:[%s7204_s1 + $0xb8] sm:$0xff]  ;;  %v109_v28 = vld [vmem:[%s7204_s1 + $0x140] sm:$0xff] }
   0xa   :  { %5237 = vmatprep.subr.mxu0 %v96_v14  ;;  %5557 = vmatpush3.msra.mxu1 %v114_v13  ;;  %v76_v27 = vld [vmem:[%s7204_s1 + $0x38] sm:$0xff]  ;;  %v91_v29 = vld [vmem:[%s7204_s1 + $0xb0] sm:$0xff] }
   0xb   :  { %5238 = vmatpush3.msra.mxu0 %v80_v15  ;;  %5558 = vmatprep.subr.mxu1 %v113_v16 }
   0xc   :  { %5239 = vmatprep.subr.mxu0 %v95_v17  ;;  %5559 = vmatpush3.msra.mxu1 %v113_v16 }
   0xd   :  { %5240 = vmatpush3.msra.mxu0 %v79_v18  ;;  %5560 = vmatprep.subr.mxu1 %v112_v19 }
   0xe   :  { %5241 = vmatprep.subr.mxu0 %v94_v20  ;;  %5561 = vmatpush3.msra.mxu1 %v112_v19 }
   0xf   :  { %5242 = vmatpush3.msra.mxu0 %v78_v21  ;;  %5562 = vmatprep.subr.mxu1 %v111_v22 }
  0x10   :  { %5243 = vmatprep.subr.mxu0 %v93_v23  ;;  %5563 = vmatpush3.msra.mxu1 %v111_v22 }
  0x11   :  { %5244 = vmatpush3.msra.mxu0 %v77_v24  ;;  %5564 = vmatprep.subr.mxu1 %v110_v25 }
  0x12   :  { %16 = vsyncpa [#allocation3], 0  ;;  %5245 = vmatprep.subr.mxu0 %v92_v26  ;;  %5565 = vmatpush3.msra.mxu1 %v110_v25  ;;  %v75_v30 = vld [vmem:[%s7204_s1 + $0x30] sm:$0xff]  ;;  %v108_v31 = vld [vmem:[%s7204_s1 + $0x138] sm:$0xff]  ;;  %v41_v51 = vlaneseq  ;;  %v6200_v56 = vmov 1.0   ;;  %vm278_vm6 = vcmask 261120  }
  0x13   :  { %5246 = vmatpush3.msra.mxu0 %v76_v27  ;;  %5566 = vmatprep.subr.mxu1 %v109_v28  ;;  %v90_v32 = vld [vmem:[%s7204_s1 + $0xa8] sm:$0xff]  ;;  %v107_v34 = vld [vmem:[%s7204_s1 + $0x130] sm:$0xff]  ;;  %v89_v35 = vld [vmem:[%s7204_s1 + $0xa0] sm:$0xff]  ;;  %vm1256_vm7 = vcmask 64512   ;;  %vm1605_vm8 = vcmask 130048   ;;  %s6201_s18 = smov 64  }
  0x14   :  { %5247 = vmatprep.subr.mxu0 %v91_v29  ;;  %5567 = vmatpush3.msra.mxu1 %v109_v28  ;;  %v74_v33 = vld [vmem:[%s7204_s1 + $0x28] sm:$0xff]  ;;  %v73_v36 = vld [vmem:[%s7204_s1 + $0x20] sm:$0xff]  ;;  %v88_v38 = vld [vmem:[%s7204_s1 + $0x98] sm:$0xff]  ;;  %v42_v52 = vand.u32 127, %v41_v51  ;;  %vm2508_vm9 = vcmask 523264   ;;  %vm6203_vm10 = vmmov 0  }
  0x15   :  { %5248 = vmatpush3.msra.mxu0 %v75_v30  ;;  %5568 = vmatprep.subr.mxu1 %v108_v31  ;;  %v106_v37 = vld [vmem:[%s7204_s1 + $0x128] sm:$0xff]  ;;  %v72_v39 = vld [vmem:[%s7204_s1 + $0x18] sm:$0xff]  ;;  %v105_v40 = vld [vmem:[%s7204_s1 + $0x120] sm:$0xff]  ;;  %s6204_s14 = smov [#allocation2]   ;;  %vm5009_vm11 = vcmask 254976  }
  0x16   :  { %5249 = vmatprep.subr.mxu0 %v90_v32  ;;  %5569 = vmatpush3.msra.mxu1 %v108_v31  ;;  %v87_v41 = vld [vmem:[%s7204_s1 + $0x90] sm:$0xff]  ;;  %v104_v43 = vld [vmem:[%s7204_s1 + $0x118] sm:$0xff]  ;;  %v86_v44 = vld [vmem:[%s7204_s1 + $0x88] sm:$0xff]  ;;  %v43_v53 = vadd.s32 128, %v42_v52  ;;  %v44_v54 = vadd.s32 256, %v42_v52  ;;  %s5017_s15 = sshll.u32 %s6204_s14, 4  ;;  %s5018_s15 = int_to_ptr.vmem [resolvable:$true] %s5017_s15 }
  0x17   :  { %5250 = vmatpush3.msra.mxu0 %v74_v33  ;;  %5570 = vmatprep.subr.mxu1 %v107_v34  ;;  %v71_v42 = vld [vmem:[%s7204_s1 + $0x10] sm:$0xff]  ;;  %v70_v45 = vld [vmem:[%s7204_s1 + $0x8] sm:$0xff]  ;;  %v85_v47 = vld [vmem:[%s7204_s1 + $0x80] sm:$0xff]  ;;  %p6182_p1 = scmp.lt.s32.totalorder %s5018_s15, %s5018_s15 }
  0x18   :  { %5251 = vmatprep.subr.mxu0 %v89_v35  ;;  %5571 = vmatpush3.msra.mxu1 %v107_v34  ;;  %v103_v46 = vld [vmem:[%s7204_s1 + $0x110] sm:$0xff]  ;;  %v69_v48 = vld [vmem:[%s7204_s1] sm:$0xff]  ;;  %v102_v49 = vld [vmem:[%s7204_s1 + $0x108] sm:$0xff] }
  0x19   :  { %5252 = vmatpush3.msra.mxu0 %v73_v36  ;;  %5572 = vmatprep.subr.mxu1 %v106_v37  ;;  %v101_v50 = vld [vmem:[%s7204_s1 + $0x100] sm:$0xff]  ;;  %v305_v8 = vld [vmem:[%s7208_s5 + $0x18] sm:$0xff]  ;;  %v304_v10 = vld [vmem:[%s7208_s5 + $0x10] sm:$0xff] }
  0x1a   :  { %5253 = vmatprep.subr.mxu0 %v88_v38  ;;  %5573 = vmatpush3.msra.mxu1 %v106_v37  ;;  %v309_v9 = vld [vmem:[%s7208_s5 + $0x38] sm:$0xff]  ;;  %v308_v11 = vld [vmem:[%s7208_s5 + $0x30] sm:$0xff]  ;;  %v303_v12 = vld [vmem:[%s7208_s5 + $0x8] sm:$0xff] }
  0x1b   :  { %5254 = vmatpush3.msra.mxu0 %v72_v39  ;;  %5574 = vmatprep.subr.mxu1 %v105_v40  ;;  %v307_v13 = vld [vmem:[%s7208_s5 + $0x28] sm:$0xff]  ;;  %v302_v14 = vld [vmem:[%s7208_s5] sm:$0xff]  ;;  %v313_v16 = vld [vmem:[%s7208_s5 + $0x58] sm:$0xff] }
  0x1c   :  { %5255 = vmatprep.subr.mxu0 %v87_v41  ;;  %5575 = vmatpush3.msra.mxu1 %v105_v40  ;;  %v306_v15 = vld [vmem:[%s7208_s5 + $0x20] sm:$0xff]  ;;  %v317_v17 = vld [vmem:[%s7208_s5 + $0x78] sm:$0xff]  ;;  %v312_v31 = vld [vmem:[%s7208_s5 + $0x50] sm:$0xff] }
  0x1d   :  { %5256 = vmatpush3.msra.mxu0 %v71_v42  ;;  %5576 = vmatprep.subr.mxu1 %v104_v43  ;;  %v5037_v25 = vld [vmem:[%s7207_s4] ss:$0 sm:$0xff]  ;;  %v316_v32 = vld [vmem:[%s7208_s5 + $0x70] sm:$0xff]  ;;  %v311_v33 = vld [vmem:[%s7208_s5 + $0x48] sm:$0xff] }
  0x1e   :  { %5257 = vmatprep.subr.mxu0 %v86_v44  ;;  %5577 = vmatpush3.msra.mxu1 %v104_v43  ;;  %v315_v34 = vld [vmem:[%s7208_s5 + $0x68] sm:$0xff]  ;;  %v310_v35 = vld [vmem:[%s7208_s5 + $0x40] sm:$0xff]  ;;  %v321_v37 = vld [vmem:[%s7208_s5 + $0x98] sm:$0xff] }
  0x1f   :  { %5258 = vmatpush3.msra.mxu0 %v70_v45  ;;  %5578 = vmatprep.subr.mxu1 %v103_v46  ;;  %v314_v36 = vld [vmem:[%s7208_s5 + $0x60] sm:$0xff]  ;;  %v325_v38 = vld [vmem:[%s7208_s5 + $0xb8] sm:$0xff]  ;;  %v320_v39 = vld [vmem:[%s7208_s5 + $0x90] sm:$0xff] }
  0x20   :  { %5259 = vmatprep.subr.mxu0 %v85_v47  ;;  %5579 = vmatpush3.msra.mxu1 %v103_v46  ;;  %v324_v40 = vld [vmem:[%s7208_s5 + $0xb0] sm:$0xff]  ;;  %v319_v41 = vld [vmem:[%s7208_s5 + $0x88] sm:$0xff]  ;;  %v318_v43 = vld [vmem:[%s7208_s5 + $0x80] sm:$0xff] }
  0x21   :  { %5260 = vmatpush3.msra.mxu0 %v69_v48  ;;  %5580 = vmatprep.subr.mxu1 %v102_v49  ;;  %v323_v42 = vld [vmem:[%s7208_s5 + $0xa8] sm:$0xff]  ;;  %v322_v44 = vld [vmem:[%s7208_s5 + $0xa0] sm:$0xff]  ;;  %v329_v45 = vld [vmem:[%s7208_s5 + $0xd8] sm:$0xff] }
  0x22   :  { %5581 = vmatpush3.msra.mxu1 %v102_v49  ;;  %5587 = vmatprep.subr.mxu0 %v305_v8  ;;  %v333_v46 = vld [vmem:[%s7208_s5 + $0xf8] sm:$0xff]  ;;  %v328_v47 = vld [vmem:[%s7208_s5 + $0xd0] sm:$0xff]  ;;  %v327_v49 = vld [vmem:[%s7208_s5 + $0xc8] sm:$0xff] }
  0x23   :  { %5582 = vmatprep.subr.mxu1 %v101_v50  ;;  %v332_v48 = vld [vmem:[%s7208_s5 + $0xf0] sm:$0xff]  ;;  %v326_v51 = vld [vmem:[%s7208_s5 + $0xc0] sm:$0xff] }
  0x24   :  { %5583 = vmatpush3.msra.mxu1 %v101_v50  ;;  %v331_v50 = vld [vmem:[%s7208_s5 + $0xe8] sm:$0xff] }
  0x25   :  { %5598 = vmatprep.subr.mxu1 %v309_v9 }
  0x7d   :  { %v47_v55 = vpop.permute.xlu0 %46 }
  0x7e   :  { %vm52_vm0 = vcmp.eq.s32.totalorder %v43_v53, %v47_v55  ;;  %vm53_vm1 = vcmp.eq.s32.totalorder %v44_v54, %v47_v55  ;;  %vm51_vm2 = vcmp.eq.s32.totalorder %v42_v52, %v47_v55  ;;  %v336_v55 = vld [vmem:[%s7208_s5 + $0x110] sm:$0xff] }
  0x7f   :  { %5031 = vmatprep.mubr.msk.f32.mxu0 %vm52_vm0, %v6200_v56  ;;  %5584 = vmatprep.mubr.msk.f32.mxu1 %vm53_vm1, %v6200_v56 }
  0x80   :  { %5032 = vmatmul.mubr.msk.f32.vlgmr.msra.gmra.mxu0 %vm51_vm2, %v6200_v56 }
  0x81   :  { %5588 = vmatpush3.msra.mxu0 %v305_v8 }
  0x82   :  { %v50_v57 = vpop.permute.xlu0 %49  ;;  %5589 = vmatprep.subr.mxu0 %v304_v10 }
  0x83   :  { %vm55_vm3 = vcmp.eq.s32.totalorder %v43_v53, %v50_v57  ;;  %vm56_vm4 = vcmp.eq.s32.totalorder %v44_v54, %v50_v57  ;;  %vm54_vm5 = vcmp.eq.s32.totalorder %v42_v52, %v50_v57  ;;  %5590 = vmatpush3.msra.mxu0 %v304_v10  ;;  %v330_v52 = vld [vmem:[%s7208_s5 + $0xe0] sm:$0xff]  ;;  %v337_v53 = vld [vmem:[%s7208_s5 + $0x118] sm:$0xff]  ;;  %v335_v57 = vld [vmem:[%s7208_s5 + $0x108] sm:$0xff] }
  0x84   :  { %5033 = vmatprep.mubr.msk.f32.mxu0 %vm55_vm3, %v6200_v56  ;;  %5585 = vmatmul.mubr.msk.f32.vlgmr.msra.gmra.mxu1 %vm56_vm4, %v6200_v56  ;;  %v341_v54 = vld [vmem:[%s7208_s5 + $0x138] sm:$0xff] }
  0x85   :  { %5034 = vmatmul.mubr.msk.f32.gmra.mxu0 %vm54_vm5, %v6200_v56  ;;  %5599 = vmatpush3.msra.mxu1 %v309_v9  ;;  %v340_v56 = vld [vmem:[%s7208_s5 + $0x130] sm:$0xff] }
  0x86   :  { %5600 = vmatprep.subr.mxu1 %v308_v11  ;;  %5591 = vmatprep.subr.mxu0 %v303_v12 }
  0x87   :  { %5601 = vmatpush3.msra.mxu1 %v308_v11  ;;  %5592 = vmatpush3.msra.mxu0 %v303_v12 }
  0x88   :  { %5602 = vmatprep.subr.mxu1 %v307_v13  ;;  %5593 = vmatprep.subr.mxu0 %v302_v14 }
  0x89   :  { %5603 = vmatpush3.msra.mxu1 %v307_v13  ;;  %5594 = vmatpush3.msra.mxu0 %v302_v14 }
  0x8a   :  { %5604 = vmatprep.subr.mxu1 %v306_v15  ;;  %5609 = vmatprep.subr.mxu0 %v313_v16 }
  0x8b   :  { %5605 = vmatpush3.msra.mxu1 %v306_v15 }
  0x8c   :  { %5620 = vmatprep.subr.mxu1 %v317_v17 }
 0x140   :  { %v5261_v58 = vpop.f32.mrf.mxu0 }
 0x142   :  { %v5262_v59 = vpop.f32.mrf.mxu0 }
 0x143   :  { %v5263_v60 = vadd.f32 %v5262_v59, %v5261_v58  ;;  %v339_v58 = vld [vmem:[%s7208_s5 + $0x128] sm:$0xff]  ;;  %v334_v59 = vld [vmem:[%s7208_s5 + $0x100] sm:$0xff] }
 0x144   :  { %v5586_v61 = vpop.f32.mrf.mxu1 }
 0x145   :  { %v5264_v62 = vpop.f32.mrf.mxu0 }
 0x146   :  { %v258_v63 = vpop.f32.mrf.mxu1 }
 0x147   :  { %v6415_v0 = vadd.f32 %v5263_v60, %v258_v63  ;;  %v5265_v1 = vpop.f32.mrf.mxu0  ;;  %v338_v60 = vld [vmem:[%s7208_s5 + $0x120] sm:$0xff]  ;;  %v344_v63 = vld [vmem:[%s7208_s5 + $0x150] sm:$0xff] }
 0x148   :  { %v5266_v2 = vadd.f32 %v5265_v1, %v5264_v62  ;;  %v349_v62 = vld [vmem:[%s7208_s5 + $0x178] sm:$0xff]  ;;  %v348_v1 = vld [vmem:[%s7208_s5 + $0x170] sm:$0xff] }
 0x149   :  { %v276_v3 = vmul.f32 %v6415_v0, %v6415_v0 }
 0x14a   :  { %v6419_v4 = vadd.f32 %v5586_v61, %v5266_v2  ;;  %v345_v61 = vld [vmem:[%s7208_s5 + $0x158] sm:$0xff]  ;;  %v343_v2 = vld [vmem:[%s7208_s5 + $0x148] sm:$0xff] }
 0x14b   :  { %v279_v5 = vsel %vm278_vm6, %v276_v3, 0.0  ;;  %v347_v3 = vld [vmem:[%s7208_s5 + $0x168] sm:$0xff] }
 0x14c   :  { %280 = vadd.xlane.f32.xlu1 %v279_v5  ;;  %v277_v6 = vmul.f32 %v6419_v4, %v6419_v4  ;;  %v342_v5 = vld [vmem:[%s7208_s5 + $0x140] sm:$0xff] }
 0x14e   :  { %v282_v7 = vsel %vm278_vm6, %v277_v6, 0.0  ;;  %v346_v6 = vld [vmem:[%s7208_s5 + $0x160] sm:$0xff] }
 0x150   :  { %283 = vadd.xlane.f32.xlu1 %v282_v7 }
 0x1d5   :  { %v281_v18 = vpop.xlane.xlu1 %280 }
 0x1d6   :  { %v286_v19 = vmul.f32 0.03125, %v281_v18 }
 0x1d8   :  { %v288_v20 = vadd.f32 1e-06, %v286_v19 }
 0x1d9   :  { %v284_v21 = vpop.xlane.xlu1 %283 }
 0x1da   :  { %6077 = vrsqrt.f32 %v288_v20  ;;  %v287_v22 = vmul.f32 0.03125, %v284_v21 }
 0x1dc   :  { %v289_v23 = vadd.f32 1e-06, %v287_v22 }
 0x1de   :  { %6079 = vrsqrt.f32 %v289_v23 }
 0x1e7   :  { %v6078_v24 = vpop.eup %6077 }
 0x1e8   :  { %v292_v26 = vmul.f32 %v6078_v24, %v6415_v0 }
 0x1ea   :  { %v6459_v27 = vmul.f32 %v5037_v25, %v292_v26 }
 0x1eb   :  { %v6080_v28 = vpop.eup %6079 }
 0x1ec   :  { %v293_v29 = vmul.f32 %v6080_v28, %v6419_v4  ;;  %5595 = vmatprep.mubr.msk.f32.mxu0 %vm278_vm6, %v6459_v27  ;;  %5606 = vmatprep.mubr.msk.f32.mxu1 %vm278_vm6, %v6459_v27 }
 0x1ee   :  { %v6466_v30 = vmul.f32 %v5037_v25, %v293_v29 }
 0x1f0   :  { %5596 = vmatmul.mubr.msk.f32.vlgmr.msra.gmra.mxu0 %vm278_vm6, %v6466_v30  ;;  %5607 = vmatmul.mubr.msk.f32.vlgmr.msra.gmra.mxu1 %vm278_vm6, %v6466_v30 }
 0x1f1   :  { %5610 = vmatpush3.msra.mxu0 %v313_v16  ;;  %5621 = vmatpush3.msra.mxu1 %v317_v17 }
 0x1f2   :  { %5611 = vmatprep.subr.mxu0 %v312_v31  ;;  %5617 = vmatprep.mubr.msk.f32.mxu0 %vm278_vm6, %v6459_v27 }
 0x1f3   :  { %5622 = vmatprep.subr.mxu1 %v316_v32  ;;  %5628 = vmatprep.mubr.msk.f32.mxu1 %vm278_vm6, %v6459_v27 }
 0x1f4   :  { %5612 = vmatpush3.msra.mxu0 %v312_v31  ;;  %5623 = vmatpush3.msra.mxu1 %v316_v32  ;;  %v268_v31 = vld [vmem:[%s7205_s2 + $0x8] sm:$0xff] }
 0x1f5   :  { %5613 = vmatprep.subr.mxu0 %v311_v33  ;;  %5624 = vmatprep.subr.mxu1 %v315_v34 }
 0x1f6   :  { %5614 = vmatpush3.msra.mxu0 %v311_v33  ;;  %5625 = vmatpush3.msra.mxu1 %v315_v34  ;;  %v270_v33 = vld [vmem:[%s7205_s2 + $0x18] sm:$0xff] }
 0x1f7   :  { %5615 = vmatprep.subr.mxu0 %v310_v35  ;;  %5626 = vmatprep.subr.mxu1 %v314_v36 }
 0x1f8   :  { %5616 = vmatpush3.msra.mxu0 %v310_v35  ;;  %5627 = vmatpush3.msra.mxu1 %v314_v36  ;;  %v267_v35 = vld [vmem:[%s7205_s2] sm:$0xff] }
 0x1f9   :  { %5618 = vmatmul.mubr.msk.f32.vlgmr.msra.gmra.mxu0 %vm278_vm6, %v6466_v30  ;;  %5629 = vmatmul.mubr.msk.f32.vlgmr.msra.gmra.mxu1 %vm278_vm6, %v6466_v30 }
 0x1fa   :  { %5631 = vmatprep.subr.mxu0 %v321_v37  ;;  %5642 = vmatprep.subr.mxu1 %v325_v38 }
 0x1fb   :  { %5632 = vmatpush3.msra.mxu0 %v321_v37  ;;  %5639 = vmatprep.mubr.msk.f32.mxu0 %vm278_vm6, %v6459_v27 }
 0x1fc   :  { %5643 = vmatpush3.msra.mxu1 %v325_v38  ;;  %5650 = vmatprep.mubr.msk.f32.mxu1 %vm278_vm6, %v6459_v27 }
 0x1fd   :  { %5633 = vmatprep.subr.mxu0 %v320_v39  ;;  %5644 = vmatprep.subr.mxu1 %v324_v40 }
 0x1fe   :  { %5634 = vmatpush3.msra.mxu0 %v320_v39  ;;  %5645 = vmatpush3.msra.mxu1 %v324_v40 }
 0x1ff   :  { %5635 = vmatprep.subr.mxu0 %v319_v41  ;;  %5646 = vmatprep.subr.mxu1 %v323_v42 }
 0x200   :  { %5636 = vmatpush3.msra.mxu0 %v319_v41  ;;  %5647 = vmatpush3.msra.mxu1 %v323_v42  ;;  %v269_v42 = vld [vmem:[%s7205_s2 + $0x10] sm:$0xff] }
 0x201   :  { %5637 = vmatprep.subr.mxu0 %v318_v43  ;;  %5648 = vmatprep.subr.mxu1 %v322_v44 }
 0x202   :  { %5638 = vmatpush3.msra.mxu0 %v318_v43  ;;  %5649 = vmatpush3.msra.mxu1 %v322_v44 }
 0x203   :  { %5640 = vmatmul.mubr.msk.f32.vlgmr.msra.gmra.mxu0 %vm278_vm6, %v6466_v30  ;;  %5651 = vmatmul.mubr.msk.f32.vlgmr.msra.gmra.mxu1 %vm278_vm6, %v6466_v30 }
 0x204   :  { %5653 = vmatprep.subr.mxu0 %v329_v45  ;;  %5664 = vmatprep.subr.mxu1 %v333_v46 }
 0x205   :  { %5654 = vmatpush3.msra.mxu0 %v329_v45  ;;  %5661 = vmatprep.mubr.msk.f32.mxu0 %vm278_vm6, %v6459_v27 }
 0x206   :  { %5665 = vmatpush3.msra.mxu1 %v333_v46  ;;  %5672 = vmatprep.mubr.msk.f32.mxu1 %vm278_vm6, %v6459_v27  ;;  %v272_v46 = vld [vmem:[%s7205_s2 + $0x28] sm:$0xff] }
 0x207   :  { %5655 = vmatprep.subr.mxu0 %v328_v47  ;;  %5666 = vmatprep.subr.mxu1 %v332_v48 }
 0x208   :  { %5656 = vmatpush3.msra.mxu0 %v328_v47  ;;  %5667 = vmatpush3.msra.mxu1 %v332_v48 }
 0x209   :  { %5657 = vmatprep.subr.mxu0 %v327_v49  ;;  %5668 = vmatprep.subr.mxu1 %v331_v50 }
 0x20a   :  { %5658 = vmatpush3.msra.mxu0 %v327_v49  ;;  %5669 = vmatpush3.msra.mxu1 %v331_v50 }
 0x20b   :  { %5659 = vmatprep.subr.mxu0 %v326_v51  ;;  %5670 = vmatprep.subr.mxu1 %v330_v52 }
 0x20c   :  { %5660 = vmatpush3.msra.mxu0 %v326_v51  ;;  %5671 = vmatpush3.msra.mxu1 %v330_v52  ;;  %v271_v52 = vld [vmem:[%s7205_s2 + $0x20] sm:$0xff] }
 0x20d   :  { %5662 = vmatmul.mubr.msk.f32.vlgmr.msra.gmra.mxu0 %vm278_vm6, %v6466_v30  ;;  %5673 = vmatmul.mubr.msk.f32.vlgmr.msra.gmra.mxu1 %vm278_vm6, %v6466_v30 }
 0x20e   :  { %5675 = vmatprep.subr.mxu0 %v337_v53  ;;  %5686 = vmatprep.subr.mxu1 %v341_v54 }
 0x20f   :  { %5676 = vmatpush3.msra.mxu0 %v337_v53  ;;  %5683 = vmatprep.mubr.msk.f32.mxu0 %vm278_vm6, %v6459_v27 }
 0x210   :  { %5687 = vmatpush3.msra.mxu1 %v341_v54  ;;  %5694 = vmatprep.mubr.msk.f32.mxu1 %vm278_vm6, %v6459_v27 }
 0x211   :  { %5677 = vmatprep.subr.mxu0 %v336_v55  ;;  %5688 = vmatprep.subr.mxu1 %v340_v56 }
 0x212   :  { %5678 = vmatpush3.msra.mxu0 %v336_v55  ;;  %5689 = vmatpush3.msra.mxu1 %v340_v56  ;;  %v273_v56 = vld [vmem:[%s7205_s2 + $0x30] sm:$0xff] }
 0x213   :  { %5679 = vmatprep.subr.mxu0 %v335_v57  ;;  %5690 = vmatprep.subr.mxu1 %v339_v58 }
 0x214   :  { %5680 = vmatpush3.msra.mxu0 %v335_v57  ;;  %5691 = vmatpush3.msra.mxu1 %v339_v58 }
 0x215   :  { %5681 = vmatprep.subr.mxu0 %v334_v59  ;;  %5692 = vmatprep.subr.mxu1 %v338_v60 }
 0x216   :  { %5682 = vmatpush3.msra.mxu0 %v334_v59  ;;  %5693 = vmatpush3.msra.mxu1 %v338_v60  ;;  %v274_v59 = vld [vmem:[%s7205_s2 + $0x38] sm:$0xff] }
 0x217   :  { %5684 = vmatmul.mubr.msk.f32.vlgmr.msra.gmra.mxu0 %vm278_vm6, %v6466_v30  ;;  %5695 = vmatmul.mubr.msk.f32.vlgmr.msra.gmra.mxu1 %vm278_vm6, %v6466_v30 }
 0x218   :  { %5697 = vmatprep.subr.mxu0 %v345_v61  ;;  %5708 = vmatprep.subr.mxu1 %v349_v62 }
 0x219   :  { %5698 = vmatpush3.msra.mxu0 %v345_v61  ;;  %5705 = vmatprep.mubr.msk.f32.mxu0 %vm278_vm6, %v6459_v27 }
 0x21a   :  { %5709 = vmatpush3.msra.mxu1 %v349_v62  ;;  %5716 = vmatprep.mubr.msk.f32.mxu1 %vm278_vm6, %v6459_v27 }
 0x21b   :  { %5699 = vmatprep.subr.mxu0 %v344_v63  ;;  %5710 = vmatprep.subr.mxu1 %v348_v1 }
 0x21c   :  { %5700 = vmatpush3.msra.mxu0 %v344_v63  ;;  %5711 = vmatpush3.msra.mxu1 %v348_v1 }
 0x21d   :  { %5701 = vmatprep.subr.mxu0 %v343_v2  ;;  %5712 = vmatprep.subr.mxu1 %v347_v3 }
 0x21e   :  { %5702 = vmatpush3.msra.mxu0 %v343_v2  ;;  %5713 = vmatpush3.msra.mxu1 %v347_v3 }
 0x21f   :  { %5703 = vmatprep.subr.mxu0 %v342_v5  ;;  %5714 = vmatprep.subr.mxu1 %v346_v6 }
 0x220   :  { %5704 = vmatpush3.msra.mxu0 %v342_v5  ;;  %5715 = vmatpush3.msra.mxu1 %v346_v6 }
 0x221   :  { %5706 = vmatmul.mubr.msk.f32.vlgmr.msra.gmra.mxu0 %vm278_vm6, %v6466_v30  ;;  %5717 = vmatmul.mubr.msk.f32.vlgmr.msra.gmra.mxu1 %vm278_vm6, %v6466_v30 }
 0x2b0   :  { %v5597_v7 = vpop.f32.mrf.mxu0  ;;  %v5608_v8 = vpop.f32.mrf.mxu1 }
 0x2b2   :  { %v422_v9 = vpop.f32.mrf.mxu0  ;;  %v497_v10 = vpop.f32.mrf.mxu1 }
 0x2b3   :  { %5723 = vmatprep.mubr.msk.f32.mxu0 %vm1256_vm7, %v422_v9  ;;  %5730 = vmatprep.mubr.msk.f32.mxu1 %vm1256_vm7, %v497_v10 }
 0x2b9   :  { %v5619_v11 = vpop.f32.mrf.mxu0  ;;  %v5630_v12 = vpop.f32.mrf.mxu1 }
 0x2bb   :  { %v572_v13 = vpop.f32.mrf.mxu0  ;;  %v647_v14 = vpop.f32.mrf.mxu1 }
 0x2c3   :  { %v5641_v15 = vpop.f32.mrf.mxu0  ;;  %v5652_v16 = vpop.f32.mrf.mxu1 }
 0x2c4   :  { %5719 = vmatprep.subr.msk.mxu0 %vm1256_vm7, %v5641_v15  ;;  %5726 = vmatprep.subr.msk.mxu1 %vm1256_vm7, %v5652_v16 }
 0x2c5   :  { %v722_v17 = vpop.f32.mrf.mxu0  ;;  %v797_v18 = vpop.f32.mrf.mxu1  ;;  %5720 = vmatpush3.xpose.msk.msra.mxu0 %vm1256_vm7, %v5641_v15  ;;  %5727 = vmatpush3.xpose.msk.msra.mxu1 %vm1256_vm7, %v5652_v16 }
 0x2c6   :  { %5721 = vmatprep.subr.msk.mxu0 %vm1256_vm7, %v722_v17  ;;  %5728 = vmatprep.subr.msk.mxu1 %vm1256_vm7, %v797_v18 }
 0x2c9   :  { %5722 = vmatpush3.xpose.msk.msra.mxu0 %vm1256_vm7, %v722_v17  ;;  %5729 = vmatpush3.xpose.msk.msra.mxu1 %vm1256_vm7, %v797_v18 }
 0x2cc   :  { %5724 = vmatmul.mubr.msk.f32.vlgmr.msra.gmra.mxu0 %vm1256_vm7, %v5597_v7  ;;  %5731 = vmatmul.mubr.msk.f32.vlgmr.msra.gmra.mxu1 %vm1256_vm7, %v5608_v8 }
 0x2cd   :  { %v5663_v19 = vpop.f32.mrf.mxu0  ;;  %v5674_v20 = vpop.f32.mrf.mxu1  ;;  %5737 = vmatprep.mubr.msk.f32.mxu0 %vm1256_vm7, %v572_v13  ;;  %5744 = vmatprep.mubr.msk.f32.mxu1 %vm1256_vm7, %v647_v14 }
 0x2ce   :  { %5733 = vmatprep.subr.msk.mxu0 %vm1256_vm7, %v5663_v19  ;;  %5740 = vmatprep.subr.msk.mxu1 %vm1256_vm7, %v5674_v20 }
 0x2cf   :  { %v872_v21 = vpop.f32.mrf.mxu0  ;;  %v947_v22 = vpop.f32.mrf.mxu1  ;;  %5734 = vmatpush3.xpose.msk.msra.mxu0 %vm1256_vm7, %v5663_v19  ;;  %5741 = vmatpush3.xpose.msk.msra.mxu1 %vm1256_vm7, %v5674_v20 }
 0x2d0   :  { %5735 = vmatprep.subr.msk.mxu0 %vm1256_vm7, %v872_v21  ;;  %5742 = vmatprep.subr.msk.mxu1 %vm1256_vm7, %v947_v22 }
 0x2d3   :  { %5736 = vmatpush3.xpose.msk.msra.mxu0 %vm1256_vm7, %v872_v21  ;;  %5743 = vmatpush3.xpose.msk.msra.mxu1 %vm1256_vm7, %v947_v22 }
 0x2d6   :  { %5738 = vmatmul.mubr.msk.f32.vlgmr.msra.gmra.mxu0 %vm1256_vm7, %v5619_v11  ;;  %5745 = vmatmul.mubr.msk.f32.vlgmr.msra.gmra.mxu1 %vm1256_vm7, %v5630_v12 }
 0x2d7   :  { %v5685_v23 = vpop.f32.mrf.mxu0  ;;  %v5696_v24 = vpop.f32.mrf.mxu1 }
 0x2d8   :  { %5747 = vmatprep.subr.mxu0 %v5685_v23  ;;  %5754 = vmatprep.subr.mxu1 %v5696_v24 }
 0x2d9   :  { %v1022_v25 = vpop.f32.mrf.mxu0  ;;  %v1097_v26 = vpop.f32.mrf.mxu1  ;;  %5748 = vmatpush3.msra.mxu0 %v5685_v23  ;;  %5755 = vmatpush3.msra.mxu1 %v5696_v24 }
 0x2da   :  { %5749 = vmatprep.subr.mxu0 %v1022_v25  ;;  %5756 = vmatprep.subr.mxu1 %v1097_v26 }
 0x2db   :  { %5750 = vmatpush3.msra.mxu0 %v1022_v25  ;;  %5757 = vmatpush3.msra.mxu1 %v1097_v26 }
 0x2e1   :  { %v6650_v27 = vpop.f32.mrf.mxu0  ;;  %v6652_v28 = vpop.f32.mrf.mxu1 }
 0x2e2   :  { %5761 = vmatprep.subr.mxu0 %v6650_v27  ;;  %5768 = vmatprep.subr.mxu1 %v6652_v28 }
 0x2e3   :  { %v6656_v29 = vpop.f32.mrf.mxu0  ;;  %v6658_v30 = vpop.f32.mrf.mxu1 }
 0x38c   :  { %v5725_v32 = vpop.f32.mrf.mxu0  ;;  %v5732_v34 = vpop.f32.mrf.mxu1 }
 0x38d   :  { %v1341_v36 = vadd.f32 %v5725_v32, %v268_v31  ;;  %v1428_v38 = vadd.f32 %v5732_v34, %v270_v33 }
 0x38e   :  { %v1335_v37 = vpop.f32.mrf.mxu0  ;;  %v1422_v41 = vpop.f32.mrf.mxu1 }
 0x38f   :  { %v1336_v39 = vadd.f32 %v1335_v37, %v267_v35  ;;  %v1609_v40 = vsel %vm1605_vm8, %v1341_v36, -inf  ;;  %v1423_v44 = vadd.f32 %v1422_v41, %v269_v42  ;;  %v1615_v45 = vsel %vm1605_vm8, %v1428_v38, -inf  ;;  %v2018_v41 = vld [vmem:[%s7209_s6] sm:$0xff]  ;;  %v2019_v42 = vld [vmem:[%s7209_s6 + $0x8] sm:$0xff] }
 0x390   :  { %1610 = vmax.xlane.f32.xlu1 %v1609_v40 }
 0x391   :  { %v1606_v43 = vsel %vm1605_vm8, %v1336_v39, -inf  ;;  %v1612_v49 = vsel %vm1605_vm8, %v1423_v44, -inf }
 0x392   :  { %1607 = vmax.xlane.f32.xlu0 %v1606_v43  ;;  %v2020_v43 = vld [vmem:[%s7209_s6 + $0x10] sm:$0xff] }
 0x394   :  { %1616 = vmax.xlane.f32.xlu1 %v1615_v45 }
 0x396   :  { %v5739_v47 = vpop.f32.mrf.mxu0  ;;  %v5746_v50 = vpop.f32.mrf.mxu1 }
 0x397   :  { %v1515_v48 = vadd.f32 %v5739_v47, %v272_v46  ;;  %v1602_v60 = vadd.f32 %v5746_v50, %v274_v59 }
 0x398   :  { %v1509_v51 = vpop.f32.mrf.mxu0  ;;  %1613 = vmax.xlane.f32.xlu1 %v1612_v49  ;;  %v1596_v55 = vpop.f32.mrf.mxu1 }
 0x399   :  { %v1510_v53 = vadd.f32 %v1509_v51, %v271_v52  ;;  %v1621_v54 = vsel %vm1605_vm8, %v1515_v48, -inf  ;;  %v1597_v57 = vadd.f32 %v1596_v55, %v273_v56  ;;  %v1627_v62 = vsel %vm1605_vm8, %v1602_v60, -inf }
 0x39b   :  { %v1618_v58 = vsel %vm1605_vm8, %v1510_v53, -inf  ;;  %v1624_v61 = vsel %vm1605_vm8, %v1597_v57, -inf }
 0x39c   :  { %1622 = vmax.xlane.f32.xlu1 %v1621_v54 }
 0x3a0   :  { %1619 = vmax.xlane.f32.xlu1 %v1618_v58 }
 0x3a4   :  { %1625 = vmax.xlane.f32.xlu1 %v1624_v61 }
 0x3a8   :  { %1628 = vmax.xlane.f32.xlu1 %v1627_v62 }
 0x419   :  { %v1611_v63 = vpop.xlane.xlu1 %1610 }
 0x41a   :  { %v1631_v1 = vsub.f32 %v1341_v36, %v1611_v63 }
 0x41b   :  { %v1608_v2 = vpop.xlane.xlu0 %1607 }
 0x41c   :  { %v1640_v3 = vmul.f32 1.442695, %v1631_v1  ;;  %v1630_v5 = vsub.f32 %v1336_v39, %v1608_v2 }
 0x41d   :  { %v1617_v6 = vpop.xlane.xlu1 %1616 }
 0x41e   :  { %6081 = vpow2.f32 %v1640_v3  ;;  %v1638_v7 = vmul.f32 1.442695, %v1630_v5  ;;  %v1633_v8 = vsub.f32 %v1428_v38, %v1617_v6 }
 0x420   :  { %6083 = vpow2.f32 %v1638_v7  ;;  %v1644_v9 = vmul.f32 1.442695, %v1633_v8 }
 0x421   :  { %v1614_v10 = vpop.xlane.xlu1 %1613 }
 0x422   :  { %6085 = vpow2.f32 %v1644_v9  ;;  %v1632_v11 = vsub.f32 %v1423_v44, %v1614_v10  ;;  %v2021_v44 = vld [vmem:[%s7209_s6 + $0x18] sm:$0xff] }
 0x424   :  { %v1642_v12 = vmul.f32 1.442695, %v1632_v11 }
 0x425   :  { %v1623_v13 = vpop.xlane.xlu1 %1622 }
 0x426   :  { %6087 = vpow2.f32 %v1642_v12  ;;  %v1635_v14 = vsub.f32 %v1515_v48, %v1623_v13 }
 0x428   :  { %v1648_v15 = vmul.f32 1.442695, %v1635_v14 }
 0x429   :  { %v1620_v16 = vpop.xlane.xlu1 %1619 }
 0x42a   :  { %6089 = vpow2.f32 %v1648_v15  ;;  %v1634_v17 = vsub.f32 %v1510_v53, %v1620_v16 }
 0x42b   :  { %v6082_v18 = vpop.eup %6081 }
 0x42c   :  { %v1646_v19 = vmul.f32 1.442695, %v1634_v17  ;;  %v1657_v20 = vsel %vm1605_vm8, %v6082_v18, 0.0 }
 0x42d   :  { %v6084_v21 = vpop.eup %6083  ;;  %v1626_v22 = vpop.xlane.xlu1 %1625  ;;  %1658 = vadd.xlane.f32.xlu0 %v1657_v20 }
 0x42e   :  { %6091 = vpow2.f32 %v1646_v19  ;;  %v1636_v23 = vsub.f32 %v1597_v57, %v1626_v22  ;;  %5751 = vmatprep.mubr.msk.f32.mxu0 %vm1605_vm8, %v6084_v21  ;;  %v1654_v24 = vsel %vm1605_vm8, %v6084_v21, 0.0 }
 0x42f   :  { %v6086_v25 = vpop.eup %6085  ;;  %5752 = vmatmul.mubr.msk.f32.vlgmr.msra.gmra.mxu0 %vm1605_vm8, %v6082_v18  ;;  %1655 = vadd.xlane.f32.xlu1 %v1654_v24 }
 0x430   :  { %v1650_v26 = vmul.f32 1.442695, %v1636_v23  ;;  %5762 = vmatpush3.msra.mxu0 %v6650_v27  ;;  %v1663_v31 = vsel %vm1605_vm8, %v6086_v25, 0.0 }
 0x431   :  { %5763 = vmatprep.subr.mxu0 %v6656_v29  ;;  %v1629_v32 = vpop.xlane.xlu1 %1628  ;;  %1664 = vadd.xlane.f32.xlu0 %v1663_v31 }
 0x432   :  { %6093 = vpow2.f32 %v1650_v26  ;;  %v1637_v33 = vsub.f32 %v1602_v60, %v1629_v32  ;;  %5764 = vmatpush3.msra.mxu0 %v6656_v29 }
 0x433   :  { %v6088_v34 = vpop.eup %6087  ;;  %5775 = vmatprep.subr.mxu0 %v2018_v41 }
 0x434   :  { %v1652_v35 = vmul.f32 1.442695, %v1637_v33  ;;  %5758 = vmatprep.mubr.msk.f32.mxu1 %vm1605_vm8, %v6088_v34  ;;  %v1660_v36 = vsel %vm1605_vm8, %v6088_v34, 0.0 }
 0x435   :  { %5759 = vmatmul.mubr.msk.f32.vlgmr.msra.gmra.mxu1 %vm1605_vm8, %v6086_v25  ;;  %1661 = vadd.xlane.f32.xlu1 %v1660_v36 }
 0x436   :  { %6095 = vpow2.f32 %v1652_v35  ;;  %5769 = vmatpush3.msra.mxu1 %v6652_v28 }
 0x437   :  { %v6090_v27 = vpop.eup %6089  ;;  %5770 = vmatprep.subr.mxu1 %v6658_v30 }
 0x438   :  { %5771 = vmatpush3.msra.mxu1 %v6658_v30  ;;  %v1669_v37 = vsel %vm1605_vm8, %v6090_v27, 0.0 }
 0x439   :  { %1670 = vadd.xlane.f32.xlu0 %v1669_v37  ;;  %5780 = vmatprep.subr.mxu1 %v2019_v42 }
 0x43b   :  { %v6092_v29 = vpop.eup %6091 }
 0x43c   :  { %5765 = vmatprep.mubr.msk.f32.mxu0 %vm1605_vm8, %v6092_v29  ;;  %v1666_v38 = vsel %vm1605_vm8, %v6092_v29, 0.0 }
 0x43d   :  { %5766 = vmatmul.mubr.msk.f32.vlgmr.msra.gmra.mxu0 %vm1605_vm8, %v6090_v27  ;;  %1667 = vadd.xlane.f32.xlu1 %v1666_v38 }
 0x43e   :  { %5776 = vmatpush3.msra.mxu0 %v2018_v41 }
 0x43f   :  { %v6094_v39 = vpop.eup %6093  ;;  %5785 = vmatprep.subr.mxu0 %v2020_v43 }
 0x440   :  { %5772 = vmatprep.mubr.msk.f32.mxu1 %vm1605_vm8, %v6094_v39  ;;  %v1672_v28 = vsel %vm1605_vm8, %v6094_v39, 0.0 }
 0x441   :  { %1673 = vadd.xlane.f32.xlu1 %v1672_v28 }
 0x443   :  { %v6096_v40 = vpop.eup %6095 }
 0x444   :  { %5773 = vmatmul.mubr.msk.f32.vlgmr.msra.gmra.mxu1 %vm1605_vm8, %v6096_v40  ;;  %v1675_v30 = vsel %vm1605_vm8, %v6096_v40, 0.0 }
 0x445   :  { %1676 = vadd.xlane.f32.xlu0 %v1675_v30  ;;  %5781 = vmatpush3.msra.mxu1 %v2019_v42 }
 0x446   :  { %5790 = vmatprep.subr.mxu1 %v2021_v44 }
 0x4b6   :  { %v1659_v46 = vpop.xlane.xlu0 %1658 }
 0x4b8   :  { %v1656_v45 = vpop.xlane.xlu1 %1655 }
 0x4b9   :  { %6097 = vrcp.f32 %v1656_v45 }
 0x4ba   :  { %6099 = vrcp.f32 %v1659_v46  ;;  %v1665_v48 = vpop.xlane.xlu0 %1664 }
 0x4be   :  { %v1662_v47 = vpop.xlane.xlu1 %1661 }
 0x4bf   :  { %6101 = vrcp.f32 %v1662_v47 }
 0x4c0   :  { %6103 = vrcp.f32 %v1665_v48 }
 0x4c2   :  { %v1671_v51 = vpop.xlane.xlu0 %1670 }
 0x4c6   :  { %v1668_v49 = vpop.xlane.xlu1 %1667  ;;  %v6098_v52 = vpop.eup %6097 }
 0x4c7   :  { %v6100_v54 = vpop.eup %6099  ;;  %6105 = vrcp.f32 %v1668_v49 }
 0x4c8   :  { %6107 = vrcp.f32 %v1671_v51 }
 0x4ca   :  { %v1674_v58 = vpop.xlane.xlu1 %1673 }
 0x4cb   :  { %6109 = vrcp.f32 %v1674_v58  ;;  %v2507_v58 = vld [vmem:[%s7212_s9 + $0x38] sm:$0xff] }
 0x4cc   :  { %v6102_v59 = vpop.eup %6101 }
 0x4cd   :  { %v6104_v62 = vpop.eup %6103 }
 0x4ce   :  { %v1677_v60 = vpop.xlane.xlu0 %1676 }
 0x4cf   :  { %6111 = vrcp.f32 %v1677_v60  ;;  %v2505_v60 = vld [vmem:[%s7212_s9 + $0x28] sm:$0xff] }
 0x4d4   :  { %v6106_v3 = vpop.eup %6105 }
 0x4d5   :  { %v6108_v6 = vpop.eup %6107 }
 0x4d8   :  { %v6110_v10 = vpop.eup %6109 }
 0x4dc   :  { %v6112_v12 = vpop.eup %6111 }
 0x4ef   :  { %v5753_v50 = vpop.f32.mrf.mxu0 }
 0x4f0   :  { %v2005_v56 = vmul.f32 %v6100_v54, %v5753_v50  ;;  %v5094_v54 = vld [vmem:[%s7210_s7] ss:$0 sm:$0xff] }
 0x4f1   :  { %v1750_v53 = vpop.f32.mrf.mxu0 }
 0x4f2   :  { %v2003_v55 = vmul.f32 %v6098_v52, %v1750_v53 }
 0x4f4   :  { %5777 = vmatprep.mubr.msk.f32.mxu0 %vm1256_vm7, %v2003_v55 }
 0x4f5   :  { %v5760_v57 = vpop.f32.mrf.mxu1  ;;  %5778 = vmatmul.mubr.msk.f32.vlgmr.msra.gmra.mxu0 %vm1256_vm7, %v2005_v56 }
 0x4f6   :  { %5786 = vmatpush3.msra.mxu0 %v2020_v43  ;;  %v2009_v1 = vmul.f32 %v6104_v62, %v5760_v57  ;;  %v2388_v43 = vld [vmem:[%s7211_s8 + $0x8] sm:$0xff]  ;;  %v2503_v62 = vld [vmem:[%s7212_s9 + $0x18] sm:$0xff] }
 0x4f7   :  { %v1831_v61 = vpop.f32.mrf.mxu1 }
 0x4f8   :  { %v2007_v63 = vmul.f32 %v6102_v59, %v1831_v61  ;;  %v2506_v59 = vld [vmem:[%s7212_s9 + $0x30] sm:$0xff]  ;;  %v2504_v61 = vld [vmem:[%s7212_s9 + $0x20] sm:$0xff] }
 0x4fa   :  { %5782 = vmatprep.mubr.msk.f32.mxu1 %vm1256_vm7, %v2007_v63  ;;  %v2502_v63 = vld [vmem:[%s7212_s9 + $0x10] sm:$0xff] }
 0x4fb   :  { %5783 = vmatmul.mubr.msk.f32.vlgmr.msra.gmra.mxu1 %vm1256_vm7, %v2009_v1  ;;  %v2501_v1 = vld [vmem:[%s7212_s9 + $0x8] sm:$0xff] }
 0x4fc   :  { %5791 = vmatpush3.msra.mxu1 %v2021_v44  ;;  %v2387_v44 = vld [vmem:[%s7211_s8] sm:$0xff] }
 0x4fd   :  { %v5767_v2 = vpop.f32.mrf.mxu0  ;;  %5806 = vmatprep.subr.mxu1 %v2507_v58 }
 0x4fe   :  { %v2013_v8 = vmul.f32 %v6108_v6, %v5767_v2  ;;  %v2500_v2 = vld [vmem:[%s7212_s9] sm:$0xff] }
 0x4ff   :  { %v1912_v5 = vpop.f32.mrf.mxu0 }
 0x500   :  { %v2011_v7 = vmul.f32 %v6106_v3, %v1912_v5 }
 0x502   :  { %5787 = vmatprep.mubr.msk.f32.mxu0 %vm1256_vm7, %v2011_v7 }
 0x503   :  { %5788 = vmatmul.mubr.msk.f32.vlgmr.msra.gmra.mxu0 %vm1256_vm7, %v2013_v8 }
 0x504   :  { %v5774_v9 = vpop.f32.mrf.mxu1 }
 0x505   :  { %v2017_v14 = vmul.f32 %v6112_v12, %v5774_v9 }
 0x506   :  { %v1993_v11 = vpop.f32.mrf.mxu1 }
 0x507   :  { %v2015_v13 = vmul.f32 %v6110_v10, %v1993_v11 }
 0x509   :  { %5792 = vmatprep.mubr.msk.f32.mxu1 %vm1256_vm7, %v2015_v13 }
 0x50a   :  { %5793 = vmatmul.mubr.msk.f32.vlgmr.msra.gmra.mxu1 %vm1256_vm7, %v2017_v14 }
 0x50b   :  { %5807 = vmatpush3.msra.mxu1 %v2507_v58  ;;  %v5119_v58 = vld [vmem:[%s7208_s5 + $0x210] sm:$0xff] }
 0x50c   :  { %5808 = vmatprep.subr.mxu1 %v2506_v59 }
 0x50d   :  { %5809 = vmatpush3.msra.mxu1 %v2506_v59  ;;  %v5106_v59 = vld [vmem:[%s7208_s5 + $0x1a8] sm:$0xff] }
 0x50e   :  { %5810 = vmatprep.subr.mxu1 %v2505_v60 }
 0x50f   :  { %5811 = vmatpush3.msra.mxu1 %v2505_v60  ;;  %v5118_v60 = vld [vmem:[%s7208_s5 + $0x208] sm:$0xff] }
 0x510   :  { %5812 = vmatprep.subr.mxu1 %v2504_v61 }
 0x511   :  { %5813 = vmatpush3.msra.mxu1 %v2504_v61  ;;  %v5105_v61 = vld [vmem:[%s7208_s5 + $0x1a0] sm:$0xff] }
 0x512   :  { %5814 = vmatprep.subr.mxu1 %v2503_v62 }
 0x513   :  { %5815 = vmatpush3.msra.mxu1 %v2503_v62  ;;  %v5117_v62 = vld [vmem:[%s7208_s5 + $0x200] sm:$0xff] }
 0x514   :  { %5816 = vmatprep.subr.mxu1 %v2502_v63 }
 0x515   :  { %5817 = vmatpush3.msra.mxu1 %v2502_v63  ;;  %v5116_v63 = vld [vmem:[%s7208_s5 + $0x1f8] sm:$0xff] }
 0x516   :  { %5818 = vmatprep.subr.mxu1 %v2501_v1 }
 0x517   :  { %5819 = vmatpush3.msra.mxu1 %v2501_v1  ;;  %v5128_v1 = vld [vmem:[%s7208_s5 + $0x258] sm:$0xff] }
 0x518   :  { %5820 = vmatprep.subr.mxu1 %v2500_v2 }
 0x519   :  { %5821 = vmatpush3.msra.mxu1 %v2500_v2  ;;  %v5115_v2 = vld [vmem:[%s7208_s5 + $0x1f0] sm:$0xff] }
 0x5b5   :  { %v5779_v15 = vpop.f32.mrf.mxu0 }
 0x5b6   :  { %v2353_v22 = vsel %vm278_vm6, %v5779_v15, 0.0 }
 0x5b7   :  { %v2094_v17 = vpop.f32.mrf.mxu0 }
 0x5b8   :  { %v2346_v26 = vsel %vm278_vm6, %v2094_v17, 0.0 }
 0x5bb   :  { %v5784_v16 = vpop.f32.mrf.mxu1 }
 0x5bc   :  { %v2354_v20 = vsel %vm278_vm6, %v5784_v16, 0.0 }
 0x5bd   :  { %v2175_v19 = vpop.f32.mrf.mxu1  ;;  %v2355_v25 = vadd.f32 %v2354_v20, %v2353_v22 }
 0x5be   :  { %v2347_v23 = vsel %vm278_vm6, %v2175_v19, 0.0 }
 0x5bf   :  { %v2348_v32 = vadd.f32 %v2347_v23, %v2346_v26 }
 0x5c3   :  { %v5789_v18 = vpop.f32.mrf.mxu0 }
 0x5c4   :  { %v2356_v24 = vsel %vm278_vm6, %v5789_v18, 0.0 }
 0x5c5   :  { %v2256_v21 = vpop.f32.mrf.mxu0  ;;  %v2357_v33 = vadd.f32 %v2356_v24, %v2355_v25 }
 0x5c6   :  { %v2349_v31 = vsel %vm278_vm6, %v2256_v21, 0.0 }
 0x5c7   :  { %v2350_v36 = vadd.f32 %v2349_v31, %v2348_v32 }
 0x5ca   :  { %v5794_v34 = vpop.f32.mrf.mxu1 }
 0x5cb   :  { %v2358_v35 = vsel %vm278_vm6, %v5794_v34, 0.0 }
 0x5cc   :  { %v2359_v27 = vadd.f32 %v2358_v35, %v2357_v33  ;;  %v2337_v37 = vpop.f32.mrf.mxu1 }
 0x5cd   :  { %v2351_v29 = vsel %vm278_vm6, %v2337_v37, 0.0 }
 0x5ce   :  { %v6743_v38 = vadd.f32 %v2359_v27, %v6419_v4  ;;  %v2352_v39 = vadd.f32 %v2351_v29, %v2350_v36  ;;  %v2390_v4 = vld [vmem:[%s7211_s8 + $0x18] sm:$0xff] }
 0x5cf   :  { %5795 = vmatprep.subr.mxu0 %v2390_v4 }
 0x5d0   :  { %v6746_v28 = vadd.f32 %v2352_v39, %v6415_v0  ;;  %v2364_v40 = vmul.f32 %v6743_v38, %v6743_v38  ;;  %v2389_v0 = vld [vmem:[%s7211_s8 + $0x10] sm:$0xff]  ;;  %5796 = vmatpush3.msra.mxu0 %v2390_v4  ;;  %v5112_v39 = vld [vmem:[%s7208_s5 + $0x1d8] sm:$0xff]  ;;  %v5109_v4 = vld [vmem:[%s7208_s5 + $0x1c0] sm:$0xff] }
 0x5d1   :  { %5797 = vmatprep.subr.mxu0 %v2389_v0  ;;  %5847 = vmatprep.subr.mxu1 %v5112_v39 }
 0x5d2   :  { %v2368_v30 = vsel %vm278_vm6, %v2364_v40, 0.0  ;;  %v2363_v41 = vmul.f32 %v6746_v28, %v6746_v28  ;;  %5798 = vmatpush3.msra.mxu0 %v2389_v0  ;;  %v5111_v40 = vld [vmem:[%s7208_s5 + $0x1d0] sm:$0xff]  ;;  %v5108_v0 = vld [vmem:[%s7208_s5 + $0x1b8] sm:$0xff] }
 0x5d3   :  { %2369 = vadd.xlane.f32.xlu0 %v2368_v30  ;;  %5799 = vmatprep.subr.mxu0 %v2388_v43  ;;  %v5102_v30 = vld [vmem:[%s7208_s5 + $0x188] sm:$0xff] }
 0x5d4   :  { %v2365_v42 = vsel %vm278_vm6, %v2363_v41, 0.0  ;;  %5800 = vmatpush3.msra.mxu0 %v2388_v43  ;;  %v5110_v41 = vld [vmem:[%s7208_s5 + $0x1c8] sm:$0xff]  ;;  %v5120_v43 = vld [vmem:[%s7208_s5 + $0x218] sm:$0xff] }
 0x5d5   :  { %2366 = vadd.xlane.f32.xlu1 %v2365_v42  ;;  %5801 = vmatprep.subr.mxu0 %v2387_v44  ;;  %v5101_v42 = vld [vmem:[%s7208_s5 + $0x180] sm:$0xff] }
 0x5d6   :  { %5802 = vmatpush3.msra.mxu0 %v2387_v44 }
 0x65c   :  { %v2370_v45 = vpop.xlane.xlu0 %2369 }
 0x65d   :  { %v2372_v46 = vmul.f32 0.03125, %v2370_v45 }
 0x65e   :  { %v2367_v47 = vpop.xlane.xlu1 %2366 }
 0x65f   :  { %v2374_v48 = vadd.f32 1e-06, %v2372_v46  ;;  %v2371_v49 = vmul.f32 0.03125, %v2367_v47 }
 0x661   :  { %6113 = vrsqrt.f32 %v2374_v48  ;;  %v2373_v50 = vadd.f32 1e-06, %v2371_v49 }
 0x663   :  { %6115 = vrsqrt.f32 %v2373_v50 }
 0x66e   :  { %v6114_v51 = vpop.eup %6113 }
 0x66f   :  { %v2378_v53 = vmul.f32 %v6114_v51, %v6743_v38 }
 0x670   :  { %v6116_v52 = vpop.eup %6115 }
 0x671   :  { %v2377_v55 = vmul.f32 %v6116_v52, %v6746_v28  ;;  %v2386_v57 = vmul.f32 %v5094_v54, %v2378_v53  ;;  %v5100_v53 = vld [vmem:[%s7207_s4 + $0x1] ss:$0 sm:$0xff] }
 0x673   :  { %v2385_v56 = vmul.f32 %v5094_v54, %v2377_v55 }
 0x675   :  { %5803 = vmatprep.mubr.msk.f32.mxu0 %vm278_vm6, %v2385_v56 }
 0x676   :  { %5804 = vmatmul.mubr.msk.f32.vlgmr.msra.gmra.mxu0 %vm278_vm6, %v2386_v57  ;;  %v5107_v57 = vld [vmem:[%s7208_s5 + $0x1b0] sm:$0xff] }
 0x736   :  { %v5805_v3 = vpop.f32.mrf.mxu0 }
 0x737   :  { %2494 = vrot.lane.b32.xlu0 %v5805_v3, %s6201_s18  ;;  %v2475_v7 = vmul.f32 0.044715, %v5805_v3  ;;  %v2473_v21 = vmul.f32 0.5, %v5805_v3 }
 0x738   :  { %v2463_v5 = vpop.f32.mrf.mxu0 }
 0x739   :  { %2492 = vrot.lane.b32.xlu1 %v2463_v5, %s6201_s18  ;;  %v2474_v6 = vmul.f32 0.044715, %v2463_v5  ;;  %v2477_v9 = vmul.f32 %v5805_v3, %v2475_v7  ;;  %v2472_v20 = vmul.f32 0.5, %v2463_v5  ;;  %v5113_v7 = vld [vmem:[%s7208_s5 + $0x1e0] sm:$0xff] }
 0x73b   :  { %v2476_v8 = vmul.f32 %v2474_v6, %v2463_v5  ;;  %v2479_v11 = vmul.f32 %v5805_v3, %v2477_v9  ;;  %v5126_v6 = vld [vmem:[%s7208_s5 + $0x248] sm:$0xff]  ;;  %v5124_v9 = vld [vmem:[%s7208_s5 + $0x238] sm:$0xff] }
 0x73d   :  { %v2478_v10 = vmul.f32 %v2476_v8, %v2463_v5  ;;  %v2481_v13 = vadd.f32 %v5805_v3, %v2479_v11  ;;  %v5127_v3 = vld [vmem:[%s7208_s5 + $0x250] sm:$0xff]  ;;  %v5125_v8 = vld [vmem:[%s7208_s5 + $0x240] sm:$0xff] }
 0x73e   :  { %v5123_v11 = vld [vmem:[%s7208_s5 + $0x230] sm:$0xff] }
 0x73f   :  { %v2480_v12 = vadd.f32 %v2478_v10, %v2463_v5  ;;  %v2483_v15 = vmul.f32 0.7978846, %v2481_v13  ;;  %v5114_v5 = vld [vmem:[%s7208_s5 + $0x1e8] sm:$0xff]  ;;  %v5136_v10 = vld [vmem:[%s7208_s5 + $0x298] sm:$0xff] }
 0x740   :  { %v5122_v13 = vld [vmem:[%s7208_s5 + $0x228] sm:$0xff] }
 0x741   :  { %v2482_v14 = vmul.f32 0.7978846, %v2480_v12  ;;  %v5135_v12 = vld [vmem:[%s7208_s5 + $0x290] sm:$0xff] }
 0x743   :  { %6117 = vtanh.f32 %v2482_v14  ;;  %v5134_v14 = vld [vmem:[%s7208_s5 + $0x288] sm:$0xff] }
 0x744   :  { %6119 = vtanh.f32 %v2483_v15  ;;  %v5121_v15 = vld [vmem:[%s7208_s5 + $0x220] sm:$0xff] }
 0x750   :  { %v6118_v16 = vpop.eup %6117 }
 0x751   :  { %v6120_v17 = vpop.eup %6119  ;;  %v2486_v18 = vadd.f32 1.0, %v6118_v16  ;;  %v5133_v16 = vld [vmem:[%s7208_s5 + $0x280] sm:$0xff] }
 0x752   :  { %v2487_v19 = vadd.f32 1.0, %v6120_v17  ;;  %v5132_v17 = vld [vmem:[%s7208_s5 + $0x278] sm:$0xff] }
 0x753   :  { %v2488_v23 = vmul.f32 %v2486_v18, %v2472_v20  ;;  %v5144_v18 = vld [vmem:[%s7208_s5 + $0x2d8] sm:$0xff]  ;;  %v5143_v20 = vld [vmem:[%s7208_s5 + $0x2d0] sm:$0xff] }
 0x754   :  { %v2489_v24 = vmul.f32 %v2487_v19, %v2473_v21  ;;  %v5131_v19 = vld [vmem:[%s7208_s5 + $0x270] sm:$0xff]  ;;  %v5130_v21 = vld [vmem:[%s7208_s5 + $0x268] sm:$0xff] }
 0x7a9   :  { %v2495_v22 = vpop.permute.xlu0 %2494 }
 0x7aa   :  { %v2499_v31 = vmul.f32 %v2495_v22, %v2489_v24  ;;  %v5142_v22 = vld [vmem:[%s7208_s5 + $0x2c8] sm:$0xff]  ;;  %v5141_v24 = vld [vmem:[%s7208_s5 + $0x2c0] sm:$0xff] }
 0x7ab   :  { %v2493_v25 = vpop.permute.xlu1 %2492 }
 0x7ac   :  { %v2498_v26 = vmul.f32 %v2493_v25, %v2488_v23  ;;  %v5129_v23 = vld [vmem:[%s7208_s5 + $0x260] sm:$0xff]  ;;  %v5140_v25 = vld [vmem:[%s7208_s5 + $0x2b8] sm:$0xff] }
 0x7ae   :  { %5822 = vmatprep.mubr.msk.f32.mxu1 %vm2508_vm9, %v2498_v26  ;;  %v5139_v26 = vld [vmem:[%s7208_s5 + $0x2b0] sm:$0xff] }
 0x7af   :  { %5823 = vmatmul.mubr.msk.f32.vlgmr.msra.gmra.mxu1 %vm2508_vm9, %v2499_v31  ;;  %v5138_v31 = vld [vmem:[%s7208_s5 + $0x2a8] sm:$0xff] }
 0x7b0   :  { %5848 = vmatpush3.msra.mxu1 %v5112_v39 }
 0x7b1   :  { %5849 = vmatprep.subr.mxu1 %v5111_v40 }
 0x7b2   :  { %5850 = vmatpush3.msra.mxu1 %v5111_v40 }
 0x7b3   :  { %5851 = vmatprep.subr.mxu1 %v5110_v41 }
 0x7b4   :  { %5852 = vmatpush3.msra.mxu1 %v5110_v41 }
 0x7b5   :  { %5853 = vmatprep.subr.mxu1 %v5109_v4 }
 0x7b6   :  { %5854 = vmatpush3.msra.mxu1 %v5109_v4 }
 0x7b7   :  { %5869 = vmatprep.subr.mxu1 %v5120_v43 }
 0x86f   :  { %v5824_v32 = vpop.f32.mrf.mxu1 }
 0x870   :  { %v6802_v33 = vadd.f32 %v5824_v32, %v6743_v38  ;;  %v5104_v38 = vld [vmem:[%s7208_s5 + $0x198] sm:$0xff]  ;;  %v5137_v32 = vld [vmem:[%s7208_s5 + $0x2a0] sm:$0xff] }
 0x871   :  { %v2581_v34 = vpop.f32.mrf.mxu1  ;;  %5825 = vmatprep.subr.mxu0 %v5104_v38 }
 0x872   :  { %v6805_v35 = vadd.f32 %v2581_v34, %v6746_v28  ;;  %v2595_v36 = vmul.f32 %v6802_v33, %v6802_v33  ;;  %v5103_v28 = vld [vmem:[%s7208_s5 + $0x190] sm:$0xff]  ;;  %5826 = vmatpush3.msra.mxu0 %v5104_v38  ;;  %v5148_v34 = vld [vmem:[%s7208_s5 + $0x2f8] sm:$0xff] }
 0x873   :  { %5827 = vmatprep.subr.mxu0 %v5103_v28 }
 0x874   :  { %v2599_v27 = vsel %vm278_vm6, %v2595_v36, 0.0  ;;  %v2594_v37 = vmul.f32 %v6805_v35, %v6805_v35  ;;  %5828 = vmatpush3.msra.mxu0 %v5103_v28  ;;  %v5147_v36 = vld [vmem:[%s7208_s5 + $0x2f0] sm:$0xff] }
 0x875   :  { %2600 = vadd.xlane.f32.xlu0 %v2599_v27  ;;  %5829 = vmatprep.subr.mxu0 %v5102_v30  ;;  %v5146_v27 = vld [vmem:[%s7208_s5 + $0x2e8] sm:$0xff] }
 0x876   :  { %v2596_v29 = vsel %vm278_vm6, %v2594_v37, 0.0  ;;  %5830 = vmatpush3.msra.mxu0 %v5102_v30  ;;  %v5145_v37 = vld [vmem:[%s7208_s5 + $0x2e0] sm:$0xff] }
 0x877   :  { %2597 = vadd.xlane.f32.xlu1 %v2596_v29  ;;  %5831 = vmatprep.subr.mxu0 %v5101_v42 }
 0x878   :  { %5832 = vmatpush3.msra.mxu0 %v5101_v42 }
 0x879   :  { %5836 = vmatprep.subr.mxu0 %v5108_v0 }
 0x8fe   :  { %v2601_v44 = vpop.xlane.xlu0 %2600 }
 0x8ff   :  { %v2603_v45 = vmul.f32 0.03125, %v2601_v44 }
 0x900   :  { %v2598_v46 = vpop.xlane.xlu1 %2597 }
 0x901   :  { %v2605_v47 = vadd.f32 1e-06, %v2603_v45  ;;  %v2602_v48 = vmul.f32 0.03125, %v2598_v46 }
 0x903   :  { %6121 = vrsqrt.f32 %v2605_v47  ;;  %v2604_v49 = vadd.f32 1e-06, %v2602_v48 }
 0x905   :  { %6123 = vrsqrt.f32 %v2604_v49 }
 0x910   :  { %v6122_v50 = vpop.eup %6121 }
 0x911   :  { %v2609_v52 = vmul.f32 %v6122_v50, %v6802_v33 }
 0x912   :  { %v6124_v51 = vpop.eup %6123 }
 0x913   :  { %v2608_v54 = vmul.f32 %v6124_v51, %v6805_v35  ;;  %v6850_v56 = vmul.f32 %v5100_v53, %v2609_v52 }
 0x915   :  { %v6848_v55 = vmul.f32 %v5100_v53, %v2608_v54 }
 0x917   :  { %5833 = vmatprep.mubr.msk.f32.mxu0 %vm278_vm6, %v6848_v55  ;;  %5855 = vmatprep.mubr.msk.f32.mxu1 %vm278_vm6, %v6848_v55 }
 0x918   :  { %5834 = vmatmul.mubr.msk.f32.vlgmr.msra.gmra.mxu0 %vm278_vm6, %v6850_v56  ;;  %5856 = vmatmul.mubr.msk.f32.vlgmr.msra.gmra.mxu1 %vm278_vm6, %v6850_v56 }
 0x919   :  { %5837 = vmatpush3.msra.mxu0 %v5108_v0  ;;  %5870 = vmatpush3.msra.mxu1 %v5120_v43 }
 0x91a   :  { %5838 = vmatprep.subr.mxu0 %v5107_v57  ;;  %5844 = vmatprep.mubr.msk.f32.mxu0 %vm278_vm6, %v6848_v55 }
 0x91b   :  { %5871 = vmatprep.subr.mxu1 %v5119_v58  ;;  %5877 = vmatprep.mubr.msk.f32.mxu1 %vm278_vm6, %v6848_v55 }
 0x91c   :  { %5839 = vmatpush3.msra.mxu0 %v5107_v57  ;;  %5872 = vmatpush3.msra.mxu1 %v5119_v58  ;;  %v6170_v58 = vld [vmem:[%s7205_s2] sm:$0xff] }
 0x91d   :  { %5840 = vmatprep.subr.mxu0 %v5106_v59  ;;  %5873 = vmatprep.subr.mxu1 %v5118_v60 }
 0x91e   :  { %5841 = vmatpush3.msra.mxu0 %v5106_v59  ;;  %5874 = vmatpush3.msra.mxu1 %v5118_v60 }
 0x91f   :  { %5842 = vmatprep.subr.mxu0 %v5105_v61  ;;  %5875 = vmatprep.subr.mxu1 %v5117_v62 }
 0x920   :  { %5843 = vmatpush3.msra.mxu0 %v5105_v61  ;;  %5876 = vmatpush3.msra.mxu1 %v5117_v62 }
 0x921   :  { %5845 = vmatmul.mubr.msk.f32.vlgmr.msra.gmra.mxu0 %vm278_vm6, %v6850_v56  ;;  %5858 = vmatprep.subr.mxu0 %v5116_v63 }
 0x922   :  { %5878 = vmatmul.mubr.msk.f32.vlgmr.msra.gmra.mxu1 %vm278_vm6, %v6850_v56  ;;  %5891 = vmatprep.subr.mxu1 %v5128_v1 }
 0x923   :  { %5859 = vmatpush3.msra.mxu0 %v5116_v63  ;;  %5866 = vmatprep.mubr.msk.f32.mxu0 %vm278_vm6, %v6848_v55 }
 0x924   :  { %5892 = vmatpush3.msra.mxu1 %v5128_v1  ;;  %5899 = vmatprep.mubr.msk.f32.mxu1 %vm278_vm6, %v6848_v55  ;;  %v6171_v1 = vld [vmem:[%s7205_s2 + $0x28] sm:$0xff] }
 0x925   :  { %5860 = vmatprep.subr.mxu0 %v5115_v2  ;;  %5893 = vmatprep.subr.mxu1 %v5127_v3 }
 0x926   :  { %5861 = vmatpush3.msra.mxu0 %v5115_v2  ;;  %5894 = vmatpush3.msra.mxu1 %v5127_v3 }
 0x927   :  { %5862 = vmatprep.subr.mxu0 %v5114_v5  ;;  %5895 = vmatprep.subr.mxu1 %v5126_v6 }
 0x928   :  { %5863 = vmatpush3.msra.mxu0 %v5114_v5  ;;  %5896 = vmatpush3.msra.mxu1 %v5126_v6  ;;  %v6172_v6 = vld [vmem:[%s7205_s2 + $0x20] sm:$0xff] }
 0x929   :  { %5864 = vmatprep.subr.mxu0 %v5113_v7  ;;  %5897 = vmatprep.subr.mxu1 %v5125_v8 }
 0x92a   :  { %5865 = vmatpush3.msra.mxu0 %v5113_v7  ;;  %5898 = vmatpush3.msra.mxu1 %v5125_v8 }
 0x92b   :  { %5867 = vmatmul.mubr.msk.f32.vlgmr.msra.gmra.mxu0 %vm278_vm6, %v6850_v56  ;;  %5880 = vmatprep.subr.mxu0 %v5124_v9 }
 0x92c   :  { %5900 = vmatmul.mubr.msk.f32.vlgmr.msra.gmra.mxu1 %vm278_vm6, %v6850_v56  ;;  %5913 = vmatprep.subr.mxu1 %v5136_v10 }
 0x92d   :  { %5881 = vmatpush3.msra.mxu0 %v5124_v9  ;;  %5888 = vmatprep.mubr.msk.f32.mxu0 %vm278_vm6, %v6848_v55 }
 0x92e   :  { %5914 = vmatpush3.msra.mxu1 %v5136_v10  ;;  %5921 = vmatprep.mubr.msk.f32.mxu1 %vm278_vm6, %v6848_v55 }
 0x92f   :  { %5882 = vmatprep.subr.mxu0 %v5123_v11  ;;  %5915 = vmatprep.subr.mxu1 %v5135_v12 }
 0x930   :  { %5883 = vmatpush3.msra.mxu0 %v5123_v11  ;;  %5916 = vmatpush3.msra.mxu1 %v5135_v12  ;;  %v6173_v12 = vld [vmem:[%s7205_s2 + $0x18] sm:$0xff] }
 0x931   :  { %5884 = vmatprep.subr.mxu0 %v5122_v13  ;;  %5917 = vmatprep.subr.mxu1 %v5134_v14 }
 0x932   :  { %5885 = vmatpush3.msra.mxu0 %v5122_v13  ;;  %5918 = vmatpush3.msra.mxu1 %v5134_v14 }
 0x933   :  { %5886 = vmatprep.subr.mxu0 %v5121_v15  ;;  %5919 = vmatprep.subr.mxu1 %v5133_v16 }
 0x934   :  { %5887 = vmatpush3.msra.mxu0 %v5121_v15  ;;  %5920 = vmatpush3.msra.mxu1 %v5133_v16  ;;  %v6174_v15 = vld [vmem:[%s7205_s2 + $0x10] sm:$0xff] }
 0x935   :  { %5889 = vmatmul.mubr.msk.f32.vlgmr.msra.gmra.mxu0 %vm278_vm6, %v6850_v56  ;;  %5902 = vmatprep.subr.mxu0 %v5132_v17 }
 0x936   :  { %5922 = vmatmul.mubr.msk.f32.vlgmr.msra.gmra.mxu1 %vm278_vm6, %v6850_v56  ;;  %5935 = vmatprep.subr.mxu1 %v5144_v18 }
 0x937   :  { %5903 = vmatpush3.msra.mxu0 %v5132_v17  ;;  %5910 = vmatprep.mubr.msk.f32.mxu0 %vm278_vm6, %v6848_v55 }
 0x938   :  { %5936 = vmatpush3.msra.mxu1 %v5144_v18  ;;  %5943 = vmatprep.mubr.msk.f32.mxu1 %vm278_vm6, %v6848_v55 }
 0x939   :  { %5904 = vmatprep.subr.mxu0 %v5131_v19  ;;  %5937 = vmatprep.subr.mxu1 %v5143_v20 }
 0x93a   :  { %5905 = vmatpush3.msra.mxu0 %v5131_v19  ;;  %5938 = vmatpush3.msra.mxu1 %v5143_v20  ;;  %v6175_v20 = vld [vmem:[%s7205_s2 + $0x38] sm:$0xff] }
 0x93b   :  { %5906 = vmatprep.subr.mxu0 %v5130_v21  ;;  %5939 = vmatprep.subr.mxu1 %v5142_v22 }
 0x93c   :  { %5907 = vmatpush3.msra.mxu0 %v5130_v21  ;;  %5940 = vmatpush3.msra.mxu1 %v5142_v22 }
 0x93d   :  { %5908 = vmatprep.subr.mxu0 %v5129_v23  ;;  %5941 = vmatprep.subr.mxu1 %v5141_v24 }
 0x93e   :  { %5909 = vmatpush3.msra.mxu0 %v5129_v23  ;;  %5942 = vmatpush3.msra.mxu1 %v5141_v24  ;;  %v6176_v23 = vld [vmem:[%s7205_s2 + $0x30] sm:$0xff] }
 0x93f   :  { %5911 = vmatmul.mubr.msk.f32.vlgmr.msra.gmra.mxu0 %vm278_vm6, %v6850_v56  ;;  %5924 = vmatprep.subr.mxu0 %v5140_v25 }
 0x940   :  { %5944 = vmatmul.mubr.msk.f32.vlgmr.msra.gmra.mxu1 %vm278_vm6, %v6850_v56  ;;  %5925 = vmatpush3.msra.mxu0 %v5140_v25 }
 0x941   :  { %5932 = vmatprep.mubr.msk.f32.mxu0 %vm278_vm6, %v6848_v55  ;;  %5926 = vmatprep.subr.mxu0 %v5139_v26 }
 0x942   :  { %5927 = vmatpush3.msra.mxu0 %v5139_v26 }
 0x943   :  { %5928 = vmatprep.subr.mxu0 %v5138_v31 }
 0x944   :  { %5929 = vmatpush3.msra.mxu0 %v5138_v31 }
 0x945   :  { %5930 = vmatprep.subr.mxu0 %v5137_v32 }
 0x946   :  { %5931 = vmatpush3.msra.mxu0 %v5137_v32 }
 0x947   :  { %5933 = vmatmul.mubr.msk.f32.vlgmr.msra.gmra.mxu0 %vm278_vm6, %v6850_v56  ;;  %5946 = vmatprep.subr.mxu0 %v5148_v34 }
 0x948   :  { %5947 = vmatpush3.msra.mxu0 %v5148_v34  ;;  %5954 = vmatprep.mubr.msk.f32.mxu0 %vm278_vm6, %v6848_v55  ;;  %v6169_v55 = vld [vmem:[%s7205_s2 + $0x8] sm:$0xff] }
 0x949   :  { %5948 = vmatprep.subr.mxu0 %v5147_v36 }
 0x94a   :  { %5949 = vmatpush3.msra.mxu0 %v5147_v36 }
 0x94b   :  { %5950 = vmatprep.subr.mxu0 %v5146_v27 }
 0x94c   :  { %5951 = vmatpush3.msra.mxu0 %v5146_v27 }
 0x94d   :  { %5952 = vmatprep.subr.mxu0 %v5145_v37 }
 0x94e   :  { %5953 = vmatpush3.msra.mxu0 %v5145_v37 }
 0x94f   :  { %5955 = vmatmul.mubr.msk.f32.vlgmr.msra.gmra.mxu0 %vm278_vm6, %v6850_v56 }
 0x9d8   :  { %v5835_v29 = vpop.f32.mrf.mxu0  ;;  %v5857_v39 = vpop.f32.mrf.mxu1 }
 0x9da   :  { %v2739_v38 = vpop.f32.mrf.mxu0  ;;  %v2889_v28 = vpop.f32.mrf.mxu1 }
 0x9db   :  { %5961 = vmatprep.mubr.msk.f32.mxu1 %vm1256_vm7, %v2739_v38 }
 0x9e1   :  { %v5846_v40 = vpop.f32.mrf.mxu0 }
 0x9e2   :  { %v5879_v30 = vpop.f32.mrf.mxu1 }
 0x9e3   :  { %5957 = vmatprep.subr.msk.mxu1 %vm1256_vm7, %v5879_v30  ;;  %v2814_v41 = vpop.f32.mrf.mxu0 }
 0x9e4   :  { %v3039_v42 = vpop.f32.mrf.mxu1  ;;  %5958 = vmatpush3.xpose.msk.msra.mxu1 %vm1256_vm7, %v5879_v30  ;;  %5968 = vmatprep.mubr.msk.f32.mxu0 %vm1256_vm7, %v2814_v41 }
 0x9e5   :  { %5959 = vmatprep.subr.msk.mxu1 %vm1256_vm7, %v3039_v42 }
 0x9e8   :  { %5960 = vmatpush3.xpose.msk.msra.mxu1 %vm1256_vm7, %v3039_v42 }
 0x9eb   :  { %5962 = vmatmul.mubr.msk.f32.vlgmr.msra.gmra.mxu1 %vm1256_vm7, %v5835_v29  ;;  %v5868_v43 = vpop.f32.mrf.mxu0 }
 0x9ec   :  { %v5901_v4 = vpop.f32.mrf.mxu1  ;;  %5975 = vmatprep.mubr.msk.f32.mxu1 %vm1256_vm7, %v2889_v28 }
 0x9ed   :  { %5971 = vmatprep.subr.msk.mxu1 %vm1256_vm7, %v5901_v4  ;;  %v2964_v44 = vpop.f32.mrf.mxu0 }
 0x9ee   :  { %v3189_v0 = vpop.f32.mrf.mxu1  ;;  %5972 = vmatpush3.xpose.msk.msra.mxu1 %vm1256_vm7, %v5901_v4 }
 0x9ef   :  { %5973 = vmatprep.subr.msk.mxu1 %vm1256_vm7, %v3189_v0 }
 0x9f2   :  { %5974 = vmatpush3.xpose.msk.msra.mxu1 %vm1256_vm7, %v3189_v0 }
 0x9f5   :  { %v5890_v45 = vpop.f32.mrf.mxu0  ;;  %5976 = vmatmul.mubr.msk.f32.vlgmr.msra.gmra.mxu1 %vm1256_vm7, %v5857_v39 }
 0x9f6   :  { %v5923_v46 = vpop.f32.mrf.mxu1  ;;  %5964 = vmatprep.subr.msk.mxu0 %vm1256_vm7, %v5890_v45 }
 0x9f7   :  { %5985 = vmatprep.subr.mxu1 %v5923_v46  ;;  %v3114_v47 = vpop.f32.mrf.mxu0  ;;  %5965 = vmatpush3.xpose.msk.msra.mxu0 %vm1256_vm7, %v5890_v45 }
 0x9f8   :  { %v3339_v48 = vpop.f32.mrf.mxu1  ;;  %5986 = vmatpush3.msra.mxu1 %v5923_v46  ;;  %5966 = vmatprep.subr.msk.mxu0 %vm1256_vm7, %v3114_v47 }
 0x9f9   :  { %5987 = vmatprep.subr.mxu1 %v3339_v48 }
 0x9fa   :  { %5988 = vmatpush3.msra.mxu1 %v3339_v48 }
 0x9fb   :  { %5967 = vmatpush3.xpose.msk.msra.mxu0 %vm1256_vm7, %v3114_v47 }
 0x9fe   :  { %5969 = vmatmul.mubr.msk.f32.vlgmr.msra.gmra.mxu0 %vm1256_vm7, %v5846_v40 }
 0x9ff   :  { %v5912_v49 = vpop.f32.mrf.mxu0  ;;  %5982 = vmatprep.mubr.msk.f32.mxu0 %vm1256_vm7, %v2964_v44 }
 0xa00   :  { %5978 = vmatprep.subr.msk.mxu0 %vm1256_vm7, %v5912_v49  ;;  %v5945_v51 = vpop.f32.mrf.mxu1 }
 0xa01   :  { %v3264_v50 = vpop.f32.mrf.mxu0  ;;  %5979 = vmatpush3.xpose.msk.msra.mxu0 %vm1256_vm7, %v5912_v49 }
 0xa02   :  { %5980 = vmatprep.subr.msk.mxu0 %vm1256_vm7, %v3264_v50  ;;  %v3489_v53 = vpop.f32.mrf.mxu1 }
 0xa05   :  { %5981 = vmatpush3.xpose.msk.msra.mxu0 %vm1256_vm7, %v3264_v50 }
 0xa06   :  { %5999 = vmatprep.subr.mxu0 %v5945_v51 }
 0xa07   :  { %v7037_v52 = vpop.f32.mrf.mxu0 }
 0xa08   :  { %5983 = vmatmul.mubr.msk.f32.vlgmr.msra.gmra.mxu0 %vm1256_vm7, %v5868_v43  ;;  %5992 = vmatprep.subr.mxu1 %v7037_v52 }
 0xa09   :  { %6000 = vmatpush3.msra.mxu0 %v5945_v51  ;;  %v7049_v63 = vpop.f32.mrf.mxu0 }
 0xa0a   :  { %6001 = vmatprep.subr.mxu0 %v3489_v53 }
 0xa0b   :  { %6002 = vmatpush3.msra.mxu0 %v3489_v53 }
 0xa0f   :  { %v7054_v5 = vpop.f32.mrf.mxu0 }
 0xa11   :  { %v7061_v10 = vpop.f32.mrf.mxu0 }
 0xaab   :  { %v5963_v54 = vpop.f32.mrf.mxu1 }
 0xaac   :  { %v3657_v56 = vadd.f32 %v6169_v55, %v5963_v54 }
 0xaad   :  { %v3651_v57 = vpop.f32.mrf.mxu1 }
 0xaae   :  { %v3652_v59 = vadd.f32 %v6170_v58, %v3651_v57  ;;  %v3924_v60 = vsel %vm1605_vm8, %v3657_v56, -inf }
 0xaaf   :  { %3925 = vmax.xlane.f32.xlu0 %v3924_v60 }
 0xab0   :  { %v3921_v61 = vsel %vm1605_vm8, %v3652_v59, -inf }
 0xab1   :  { %3922 = vmax.xlane.f32.xlu1 %v3921_v61 }
 0xab5   :  { %v5977_v62 = vpop.f32.mrf.mxu1 }
 0xab6   :  { %v3831_v2 = vadd.f32 %v6171_v1, %v5977_v62 }
 0xab7   :  { %v3825_v3 = vpop.f32.mrf.mxu1 }
 0xab8   :  { %v3826_v7 = vadd.f32 %v6172_v6, %v3825_v3  ;;  %v3936_v8 = vsel %vm1605_vm8, %v3831_v2, -inf  ;;  %v5199_v6 = vld [vmem:[%s7209_s6 + $0x30] sm:$0xff] }
 0xab9   :  { %3937 = vmax.xlane.f32.xlu0 %v3936_v8  ;;  %v5200_v8 = vld [vmem:[%s7209_s6 + $0x38] sm:$0xff] }
 0xaba   :  { %v3933_v9 = vsel %vm1605_vm8, %v3826_v7, -inf }
 0xabb   :  { %3934 = vmax.xlane.f32.xlu1 %v3933_v9 }
 0xabe   :  { %v5970_v11 = vpop.f32.mrf.mxu0 }
 0xabf   :  { %v3744_v13 = vadd.f32 %v6173_v12, %v5970_v11 }
 0xac0   :  { %v3738_v14 = vpop.f32.mrf.mxu0 }
 0xac1   :  { %v3739_v16 = vadd.f32 %v6174_v15, %v3738_v14  ;;  %v3930_v17 = vsel %vm1605_vm8, %v3744_v13, -inf }
 0xac2   :  { %3931 = vmax.xlane.f32.xlu0 %v3930_v17 }
 0xac3   :  { %v3927_v18 = vsel %vm1605_vm8, %v3739_v16, -inf }
 0xac4   :  { %3928 = vmax.xlane.f32.xlu1 %v3927_v18 }
 0xac8   :  { %v5984_v19 = vpop.f32.mrf.mxu0 }
 0xac9   :  { %v3918_v21 = vadd.f32 %v6175_v20, %v5984_v19 }
 0xaca   :  { %v3912_v22 = vpop.f32.mrf.mxu0 }
 0xacb   :  { %v3913_v24 = vadd.f32 %v6176_v23, %v3912_v22  ;;  %v3942_v25 = vsel %vm1605_vm8, %v3918_v21, -inf }
 0xacc   :  { %3943 = vmax.xlane.f32.xlu0 %v3942_v25 }
 0xacd   :  { %v3939_v26 = vsel %vm1605_vm8, %v3913_v24, -inf }
 0xace   :  { %3940 = vmax.xlane.f32.xlu1 %v3939_v26 }
 0xb38   :  { %v3926_v31 = vpop.xlane.xlu0 %3925 }
 0xb39   :  { %v3946_v32 = vsub.f32 %v3657_v56, %v3926_v31 }
 0xb3a   :  { %v3923_v34 = vpop.xlane.xlu1 %3922 }
 0xb3b   :  { %v3955_v36 = vmul.f32 1.442695, %v3946_v32  ;;  %v3945_v27 = vsub.f32 %v3652_v59, %v3923_v34 }
 0xb3d   :  { %6125 = vpow2.f32 %v3955_v36  ;;  %v3953_v37 = vmul.f32 1.442695, %v3945_v27 }
 0xb3f   :  { %6127 = vpow2.f32 %v3953_v37 }
 0xb42   :  { %v3938_v29 = vpop.xlane.xlu0 %3937 }
 0xb43   :  { %v3950_v38 = vsub.f32 %v3831_v2, %v3938_v29 }
 0xb44   :  { %v3935_v39 = vpop.xlane.xlu1 %3934 }
 0xb45   :  { %v3963_v28 = vmul.f32 1.442695, %v3950_v38  ;;  %v3949_v40 = vsub.f32 %v3826_v7, %v3935_v39  ;;  %v5198_v7 = vld [vmem:[%s7209_s6 + $0x28] sm:$0xff] }
 0xb47   :  { %6129 = vpow2.f32 %v3963_v28  ;;  %v3961_v30 = vmul.f32 1.442695, %v3949_v40 }
 0xb49   :  { %6131 = vpow2.f32 %v3961_v30 }
 0xb4a   :  { %v6126_v41 = vpop.eup %6125 }
 0xb4b   :  { %v3932_v42 = vpop.xlane.xlu0 %3931  ;;  %v3972_v4 = vsel %vm1605_vm8, %v6126_v41, 0.0 }
 0xb4c   :  { %v6128_v0 = vpop.eup %6127  ;;  %v3948_v43 = vsub.f32 %v3744_v13, %v3932_v42  ;;  %3973 = vadd.xlane.f32.xlu0 %v3972_v4 }
 0xb4d   :  { %v3929_v44 = vpop.xlane.xlu1 %3928  ;;  %5989 = vmatprep.mubr.msk.f32.mxu1 %vm1605_vm8, %v6128_v0  ;;  %v3969_v45 = vsel %vm1605_vm8, %v6128_v0, 0.0 }
 0xb4e   :  { %v3959_v46 = vmul.f32 1.442695, %v3948_v43  ;;  %v3947_v47 = vsub.f32 %v3739_v16, %v3929_v44  ;;  %5990 = vmatmul.mubr.msk.f32.vlgmr.msra.gmra.mxu1 %vm1605_vm8, %v6126_v41  ;;  %3970 = vadd.xlane.f32.xlu1 %v3969_v45 }
 0xb4f   :  { %5993 = vmatpush3.msra.mxu1 %v7037_v52 }
 0xb50   :  { %6133 = vpow2.f32 %v3959_v46  ;;  %v3957_v48 = vmul.f32 1.442695, %v3947_v47  ;;  %5994 = vmatprep.subr.mxu1 %v7049_v63 }
 0xb51   :  { %5995 = vmatpush3.msra.mxu1 %v7049_v63 }
 0xb52   :  { %6135 = vpow2.f32 %v3957_v48  ;;  %6006 = vmatprep.subr.mxu1 %v7054_v5 }
 0xb54   :  { %v6130_v49 = vpop.eup %6129 }
 0xb55   :  { %v3944_v50 = vpop.xlane.xlu0 %3943  ;;  %v3984_v51 = vsel %vm1605_vm8, %v6130_v49, 0.0 }
 0xb56   :  { %v6132_v53 = vpop.eup %6131  ;;  %v3952_v54 = vsub.f32 %v3918_v21, %v3944_v50  ;;  %3985 = vadd.xlane.f32.xlu0 %v3984_v51 }
 0xb57   :  { %v3941_v55 = vpop.xlane.xlu1 %3940  ;;  %6003 = vmatprep.mubr.msk.f32.mxu0 %vm1605_vm8, %v6132_v53  ;;  %v3981_v52 = vsel %vm1605_vm8, %v6132_v53, 0.0 }
 0xb58   :  { %v3967_v56 = vmul.f32 1.442695, %v3952_v54  ;;  %v3951_v57 = vsub.f32 %v3913_v24, %v3941_v55  ;;  %6004 = vmatmul.mubr.msk.f32.vlgmr.msra.gmra.mxu0 %vm1605_vm8, %v6130_v49  ;;  %3982 = vadd.xlane.f32.xlu1 %v3981_v52 }
 0xb5a   :  { %6137 = vpow2.f32 %v3967_v56  ;;  %v3965_v58 = vmul.f32 1.442695, %v3951_v57 }
 0xb5c   :  { %6139 = vpow2.f32 %v3965_v58 }
 0xb5d   :  { %v6134_v59 = vpop.eup %6133 }
 0xb5e   :  { %v3978_v60 = vsel %vm1605_vm8, %v6134_v59, 0.0 }
 0xb5f   :  { %v6136_v61 = vpop.eup %6135  ;;  %3979 = vadd.xlane.f32.xlu0 %v3978_v60 }
 0xb60   :  { %5996 = vmatprep.mubr.msk.f32.mxu1 %vm1605_vm8, %v6136_v61  ;;  %v3975_v62 = vsel %vm1605_vm8, %v6136_v61, 0.0 }
 0xb61   :  { %5997 = vmatmul.mubr.msk.f32.vlgmr.msra.gmra.mxu1 %vm1605_vm8, %v6134_v59  ;;  %3976 = vadd.xlane.f32.xlu1 %v3975_v62 }
 0xb62   :  { %6007 = vmatpush3.msra.mxu1 %v7054_v5  ;;  %v5197_v5 = vld [vmem:[%s7209_s6 + $0x20] sm:$0xff] }
 0xb63   :  { %6008 = vmatprep.subr.mxu1 %v7061_v10  ;;  %6013 = vmatprep.subr.mxu0 %v5197_v5 }
 0xb64   :  { %6009 = vmatpush3.msra.mxu1 %v7061_v10  ;;  %6014 = vmatpush3.msra.mxu0 %v5197_v5 }
 0xb65   :  { %6023 = vmatprep.subr.mxu0 %v5199_v6  ;;  %6018 = vmatprep.subr.mxu1 %v5198_v7 }
 0xb67   :  { %v6138_v63 = vpop.eup %6137 }
 0xb68   :  { %v3990_v1 = vsel %vm1605_vm8, %v6138_v63, 0.0 }
 0xb69   :  { %v6140_v2 = vpop.eup %6139  ;;  %3991 = vadd.xlane.f32.xlu0 %v3990_v1 }
 0xb6a   :  { %6010 = vmatprep.mubr.msk.f32.mxu1 %vm1605_vm8, %v6140_v2  ;;  %v3987_v3 = vsel %vm1605_vm8, %v6140_v2, 0.0 }
 0xb6b   :  { %6011 = vmatmul.mubr.msk.f32.vlgmr.msra.gmra.mxu1 %vm1605_vm8, %v6138_v63  ;;  %3988 = vadd.xlane.f32.xlu1 %v3987_v3 }
 0xb6c   :  { %6019 = vmatpush3.msra.mxu1 %v5198_v7  ;;  %v5212_v7 = vld [vmem:[%s7211_s8 + $0x28] sm:$0xff] }
 0xb6d   :  { %6028 = vmatprep.subr.mxu1 %v5200_v8 }
 0xbd5   :  { %v3974_v10 = vpop.xlane.xlu0 %3973 }
 0xbd7   :  { %v3971_v9 = vpop.xlane.xlu1 %3970 }
 0xbd8   :  { %6141 = vrcp.f32 %v3971_v9 }
 0xbd9   :  { %6143 = vrcp.f32 %v3974_v10 }
 0xbdf   :  { %v3986_v12 = vpop.xlane.xlu0 %3985 }
 0xbe1   :  { %v3983_v11 = vpop.xlane.xlu1 %3982 }
 0xbe2   :  { %6145 = vrcp.f32 %v3983_v11 }
 0xbe3   :  { %6147 = vrcp.f32 %v3986_v12 }
 0xbe5   :  { %v6142_v14 = vpop.eup %6141 }
 0xbe6   :  { %v6144_v16 = vpop.eup %6143 }
 0xbe8   :  { %v3980_v20 = vpop.xlane.xlu0 %3979 }
 0xbea   :  { %v3977_v19 = vpop.xlane.xlu1 %3976 }
 0xbeb   :  { %6149 = vrcp.f32 %v3977_v19 }
 0xbec   :  { %6151 = vrcp.f32 %v3980_v20 }
 0xbef   :  { %v6146_v22 = vpop.eup %6145 }
 0xbf0   :  { %v6148_v24 = vpop.eup %6147 }
 0xbf2   :  { %v3992_v32 = vpop.xlane.xlu0 %3991 }
 0xbf4   :  { %v3989_v31 = vpop.xlane.xlu1 %3988 }
 0xbf5   :  { %6153 = vrcp.f32 %v3989_v31  ;;  %v5219_v31 = vld [vmem:[%s7212_s9 + $0x50] sm:$0xff] }
 0xbf6   :  { %6155 = vrcp.f32 %v3992_v32  ;;  %v5218_v32 = vld [vmem:[%s7212_s9 + $0x48] sm:$0xff] }
 0xbf8   :  { %v6150_v36 = vpop.eup %6149 }
 0xbf9   :  { %v6152_v37 = vpop.eup %6151 }
 0xc02   :  { %v6154_v28 = vpop.eup %6153 }
 0xc03   :  { %v6156_v30 = vpop.eup %6155 }
 0xc0e   :  { %v5991_v13 = vpop.f32.mrf.mxu1 }
 0xc0f   :  { %v4320_v18 = vmul.f32 %v6144_v16, %v5991_v13 }
 0xc10   :  { %v4065_v15 = vpop.f32.mrf.mxu1 }
 0xc11   :  { %v4318_v17 = vmul.f32 %v6142_v14, %v4065_v15 }
 0xc13   :  { %6015 = vmatprep.mubr.msk.f32.mxu0 %vm1256_vm7, %v4318_v17 }
 0xc14   :  { %6016 = vmatmul.mubr.msk.f32.vlgmr.msra.gmra.mxu0 %vm1256_vm7, %v4320_v18  ;;  %v5210_v18 = vld [vmem:[%s7210_s7 + $0x1] ss:$0 sm:$0xff] }
 0xc15   :  { %6024 = vmatpush3.msra.mxu0 %v5199_v6 }
 0xc18   :  { %v6005_v21 = vpop.f32.mrf.mxu0 }
 0xc19   :  { %v4328_v26 = vmul.f32 %v6148_v24, %v6005_v21  ;;  %v5222_v24 = vld [vmem:[%s7212_s9 + $0x68] sm:$0xff] }
 0xc1a   :  { %v4227_v23 = vpop.f32.mrf.mxu0 }
 0xc1b   :  { %v4326_v25 = vmul.f32 %v6146_v22, %v4227_v23  ;;  %v5224_v22 = vld [vmem:[%s7212_s9 + $0x78] sm:$0xff]  ;;  %v5223_v23 = vld [vmem:[%s7212_s9 + $0x70] sm:$0xff] }
 0xc1d   :  { %6025 = vmatprep.mubr.msk.f32.mxu0 %vm1256_vm7, %v4326_v25  ;;  %v5221_v25 = vld [vmem:[%s7212_s9 + $0x60] sm:$0xff] }
 0xc1e   :  { %6026 = vmatmul.mubr.msk.f32.vlgmr.msra.gmra.mxu0 %vm1256_vm7, %v4328_v26  ;;  %v5220_v26 = vld [vmem:[%s7212_s9 + $0x58] sm:$0xff] }
 0xc21   :  { %v5998_v34 = vpop.f32.mrf.mxu1 }
 0xc22   :  { %v4324_v38 = vmul.f32 %v6152_v37, %v5998_v34  ;;  %v5217_v34 = vld [vmem:[%s7212_s9 + $0x40] sm:$0xff] }
 0xc23   :  { %v4146_v27 = vpop.f32.mrf.mxu1 }
 0xc24   :  { %v4322_v29 = vmul.f32 %v6150_v36, %v4146_v27 }
 0xc26   :  { %6020 = vmatprep.mubr.msk.f32.mxu1 %vm1256_vm7, %v4322_v29 }
 0xc27   :  { %6021 = vmatmul.mubr.msk.f32.vlgmr.msra.gmra.mxu1 %vm1256_vm7, %v4324_v38 }
 0xc28   :  { %6029 = vmatpush3.msra.mxu1 %v5200_v8  ;;  %v5211_v8 = vld [vmem:[%s7211_s8 + $0x20] sm:$0xff] }
 0xc29   :  { %6044 = vmatprep.subr.mxu1 %v5224_v22 }
 0xc2b   :  { %v6012_v39 = vpop.f32.mrf.mxu1 }
 0xc2c   :  { %v4332_v42 = vmul.f32 %v6156_v30, %v6012_v39 }
 0xc2d   :  { %v4308_v40 = vpop.f32.mrf.mxu1 }
 0xc2e   :  { %v4330_v41 = vmul.f32 %v6154_v28, %v4308_v40 }
 0xc30   :  { %6030 = vmatprep.mubr.msk.f32.mxu1 %vm1256_vm7, %v4330_v41 }
 0xc31   :  { %6031 = vmatmul.mubr.msk.f32.vlgmr.msra.gmra.mxu1 %vm1256_vm7, %v4332_v42 }
 0xc32   :  { %6045 = vmatpush3.msra.mxu1 %v5224_v22 }
 0xc33   :  { %6046 = vmatprep.subr.mxu1 %v5223_v23 }
 0xc34   :  { %6047 = vmatpush3.msra.mxu1 %v5223_v23 }
 0xc35   :  { %6048 = vmatprep.subr.mxu1 %v5222_v24 }
 0xc36   :  { %6049 = vmatpush3.msra.mxu1 %v5222_v24 }
 0xc37   :  { %6050 = vmatprep.subr.mxu1 %v5221_v25 }
 0xc38   :  { %6051 = vmatpush3.msra.mxu1 %v5221_v25 }
 0xc39   :  { %6052 = vmatprep.subr.mxu1 %v5220_v26 }
 0xc3a   :  { %6053 = vmatpush3.msra.mxu1 %v5220_v26 }
 0xc3b   :  { %6054 = vmatprep.subr.mxu1 %v5219_v31 }
 0xc3c   :  { %6055 = vmatpush3.msra.mxu1 %v5219_v31 }
 0xc3d   :  { %6056 = vmatprep.subr.mxu1 %v5218_v32 }
 0xc3e   :  { %6057 = vmatpush3.msra.mxu1 %v5218_v32 }
 0xc3f   :  { %6058 = vmatprep.subr.mxu1 %v5217_v34 }
 0xc40   :  { %6059 = vmatpush3.msra.mxu1 %v5217_v34 }
 0xcd4   :  { %v6017_v4 = vpop.f32.mrf.mxu0 }
 0xcd5   :  { %v4669_v47 = vsel %vm278_vm6, %v6017_v4, 0.0 }
 0xcd6   :  { %v4410_v43 = vpop.f32.mrf.mxu0 }
 0xcd7   :  { %v4662_v50 = vsel %vm278_vm6, %v4410_v43, 0.0 }
 0xcde   :  { %v6027_v46 = vpop.f32.mrf.mxu0 }
 0xcdf   :  { %v4672_v54 = vsel %vm278_vm6, %v6027_v46, 0.0 }
 0xce0   :  { %v4572_v51 = vpop.f32.mrf.mxu0 }
 0xce1   :  { %v4665_v56 = vsel %vm278_vm6, %v4572_v51, 0.0 }
 0xce7   :  { %v6022_v0 = vpop.f32.mrf.mxu1 }
 0xce8   :  { %v4670_v45 = vsel %vm278_vm6, %v6022_v0, 0.0 }
 0xce9   :  { %v4491_v44 = vpop.f32.mrf.mxu1  ;;  %v4671_v49 = vadd.f32 %v4670_v45, %v4669_v47 }
 0xcea   :  { %v4663_v48 = vsel %vm278_vm6, %v4491_v44, 0.0 }
 0xceb   :  { %v4664_v53 = vadd.f32 %v4663_v48, %v4662_v50  ;;  %v4673_v52 = vadd.f32 %v4672_v54, %v4671_v49 }
 0xced   :  { %v4666_v60 = vadd.f32 %v4665_v56, %v4664_v53 }
 0xcf1   :  { %v6032_v55 = vpop.f32.mrf.mxu1 }
 0xcf2   :  { %v4674_v57 = vsel %vm278_vm6, %v6032_v55, 0.0 }
 0xcf3   :  { %v4675_v58 = vadd.f32 %v4674_v57, %v4673_v52  ;;  %v4653_v59 = vpop.f32.mrf.mxu1 }
 0xcf4   :  { %v4667_v61 = vsel %vm278_vm6, %v4653_v59, 0.0 }
 0xcf5   :  { %v7131_v62 = vadd.f32 %v4675_v58, %v6802_v33  ;;  %v4668_v63 = vadd.f32 %v4667_v61, %v4666_v60  ;;  %v5214_v33 = vld [vmem:[%s7211_s8 + $0x38] sm:$0xff] }
 0xcf6   :  { %6033 = vmatprep.subr.mxu0 %v5214_v33 }
 0xcf7   :  { %v7134_v1 = vadd.f32 %v4668_v63, %v6805_v35  ;;  %v4681_v2 = vmul.f32 %v7131_v62, %v7131_v62  ;;  %v5213_v35 = vld [vmem:[%s7211_s8 + $0x30] sm:$0xff]  ;;  %6034 = vmatpush3.msra.mxu0 %v5214_v33  ;;  %v6202_v63 = vmov 0.0  }
 0xcf8   :  { %6035 = vmatprep.subr.mxu0 %v5213_v35 }
 0xcf9   :  { %v4685_v3 = vsel %vm278_vm6, %v4681_v2, 0.0  ;;  %v4680_v5 = vmul.f32 %v7134_v1, %v7134_v1  ;;  %6036 = vmatpush3.msra.mxu0 %v5213_v35  ;;  %v5227_v35 = vld [vmem:[%s7213_s10] ss:$0 sm:$0xff]  ;;  %s6177_s10 = scalar_lea.vmem %s5018_s15, 32 }
 0xcfa   :  { %4686 = vadd.xlane.f32.xlu0 %v4685_v3  ;;  %6037 = vmatprep.subr.mxu0 %v5212_v7  ;;  %p6178_p0 = scmp.ne.s32.totalorder %s5018_s15, %s6177_s10  ;;  %p6183_p2 = scmp.lt.s32.totalorder %s6177_s10, %s6177_s10 }
 0xcfb   :  { %v4682_v6 = vsel %vm278_vm6, %v4680_v5, 0.0  ;;  %6038 = vmatpush3.msra.mxu0 %v5212_v7 }
 0xcfc   :  { %4683 = vadd.xlane.f32.xlu1 %v4682_v6  ;;  %6039 = vmatprep.subr.mxu0 %v5211_v8  ;;  %p6184_p3 = por %p6183_p2, %p6182_p1 }
 0xcfd   :  { %6040 = vmatpush3.msra.mxu0 %v5211_v8 }
 0xcfe   :  { %6063 = vmatprep.subr.mxu0 %v6202_v63  ;;  %p6185_p4 = pnand %p6184_p3, %p6178_p0 }
 0xd83   :  { %v4687_v9 = vpop.xlane.xlu0 %4686 }
 0xd84   :  { %v4689_v10 = vmul.f32 0.03125, %v4687_v9 }
 0xd85   :  { %v4684_v11 = vpop.xlane.xlu1 %4683 }
 0xd86   :  { %v4691_v12 = vadd.f32 1e-06, %v4689_v10  ;;  %v4688_v13 = vmul.f32 0.03125, %v4684_v11 }
 0xd88   :  { %6157 = vrsqrt.f32 %v4691_v12  ;;  %v4690_v14 = vadd.f32 1e-06, %v4688_v13  ;;  %v4935_v12 = vld [vmem:[%s7206_s3] sm:$0x3] }
 0xd8a   :  { %6159 = vrsqrt.f32 %v4690_v14 }
 0xd95   :  { %v6158_v15 = vpop.eup %6157 }
 0xd96   :  { %v4695_v17 = vmul.f32 %v6158_v15, %v7131_v62 }
 0xd97   :  { %v6160_v16 = vpop.eup %6159 }
 0xd98   :  { %v4694_v19 = vmul.f32 %v6160_v16, %v7134_v1  ;;  %v4703_v21 = vmul.f32 %v5210_v18, %v4695_v17 }
 0xd9a   :  { %v4702_v20 = vmul.f32 %v5210_v18, %v4694_v19 }
 0xd9c   :  { %6041 = vmatprep.mubr.msk.f32.mxu0 %vm278_vm6, %v4702_v20 }
 0xd9d   :  { %6042 = vmatmul.mubr.msk.f32.vlgmr.msra.gmra.mxu0 %vm278_vm6, %v4703_v21 }
 0xd9e   :  { %6067 = vmatprep.mubr.msk.f32.mxu0 %vm6203_vm10, %v6202_v63 }
 0xe5d   :  { %v6043_v36 = vpop.f32.mrf.mxu0 }
 0xe5e   :  { %4812 = vrot.lane.b32.xlu0 %v6043_v36, %s6201_s18  ;;  %v4793_v29 = vmul.f32 0.044715, %v6043_v36  ;;  %v4791_v47 = vmul.f32 0.5, %v6043_v36 }
 0xe5f   :  { %v4781_v27 = vpop.f32.mrf.mxu0 }
 0xe60   :  { %4810 = vrot.lane.b32.xlu1 %v4781_v27, %s6201_s18  ;;  %v4792_v37 = vmul.f32 0.044715, %v4781_v27  ;;  %v4795_v39 = vmul.f32 %v6043_v36, %v4793_v29  ;;  %v4790_v46 = vmul.f32 0.5, %v4781_v27 }
 0xe62   :  { %v4794_v38 = vmul.f32 %v4792_v37, %v4781_v27  ;;  %v4797_v40 = vmul.f32 %v6043_v36, %v4795_v39 }
 0xe64   :  { %v4796_v28 = vmul.f32 %v4794_v38, %v4781_v27  ;;  %v4799_v41 = vadd.f32 %v6043_v36, %v4797_v40 }
 0xe66   :  { %v4798_v30 = vadd.f32 %v4796_v28, %v4781_v27  ;;  %v4801_v4 = vmul.f32 0.7978846, %v4799_v41 }
 0xe68   :  { %v4800_v42 = vmul.f32 0.7978846, %v4798_v30 }
 0xe6a   :  { %6161 = vtanh.f32 %v4800_v42 }
 0xe6b   :  { %6163 = vtanh.f32 %v4801_v4 }
 0xe77   :  { %v6162_v0 = vpop.eup %6161 }
 0xe78   :  { %v6164_v43 = vpop.eup %6163  ;;  %v4804_v44 = vadd.f32 1.0, %v6162_v0 }
 0xe79   :  { %v4805_v45 = vadd.f32 1.0, %v6164_v43 }
 0xe7a   :  { %v4806_v49 = vmul.f32 %v4804_v44, %v4790_v46 }
 0xe7b   :  { %v4807_v50 = vmul.f32 %v4805_v45, %v4791_v47 }
 0xed0   :  { %v4813_v48 = vpop.permute.xlu0 %4812 }
 0xed1   :  { %v4817_v54 = vmul.f32 %v4813_v48, %v4807_v50 }
 0xed2   :  { %v4811_v51 = vpop.permute.xlu1 %4810 }
 0xed3   :  { %v4816_v53 = vmul.f32 %v4811_v51, %v4806_v49 }
 0xed5   :  { %6060 = vmatprep.mubr.msk.f32.mxu1 %vm2508_vm9, %v4816_v53 }
 0xed6   :  { %6061 = vmatmul.mubr.msk.f32.vlgmr.msra.gmra.mxu1 %vm2508_vm9, %v4817_v54 }
 0xf96   :  { %v6062_v55 = vpop.f32.mrf.mxu1 }
 0xf97   :  { %v4909_v52 = vadd.f32 %v6062_v55, %v7131_v62 }
 0xf98   :  { %v4899_v56 = vpop.f32.mrf.mxu1 }
 0xf99   :  { %v4908_v57 = vadd.f32 %v4899_v56, %v7134_v1  ;;  %v4912_v58 = vmul.f32 %v4909_v52, %v4909_v52 }
 0xf9b   :  { %v4916_v59 = vsel %vm278_vm6, %v4912_v58, 0.0  ;;  %v4911_v60 = vmul.f32 %v4908_v57, %v4908_v57 }
 0xf9c   :  { %4917 = vadd.xlane.f32.xlu1 %v4916_v59 }
 0xf9d   :  { %v4913_v61 = vsel %vm278_vm6, %v4911_v60, 0.0 }
 0xf9e   :  { %4914 = vadd.xlane.f32.xlu0 %v4913_v61 }
0x1025   :  { %v4918_v2 = vpop.xlane.xlu1 %4917 }
0x1026   :  { %v4920_v3 = vmul.f32 0.03125, %v4918_v2 }
0x1027   :  { %v4915_v5 = vpop.xlane.xlu0 %4914 }
0x1028   :  { %v4922_v6 = vadd.f32 1e-06, %v4920_v3  ;;  %v4919_v62 = vmul.f32 0.03125, %v4915_v5 }
0x102a   :  { %6165 = vrsqrt.f32 %v4922_v6  ;;  %v4921_v33 = vadd.f32 1e-06, %v4919_v62 }
0x102c   :  { %6167 = vrsqrt.f32 %v4921_v33 }
0x1037   :  { %v6166_v1 = vpop.eup %6165 }
0x1038   :  { %v4926_v7 = vmul.f32 %v6166_v1, %v4909_v52 }
0x1039   :  { %v6168_v8 = vpop.eup %6167 }
0x103a   :  { %v4934_v9 = vmul.f32 %v5227_v35, %v4926_v7  ;;  %v4925_v10 = vmul.f32 %v6168_v8, %v4908_v57 }
0x103c   :  { %6064 = vmatpush3.msra.mxu0 %v4934_v9  ;;  %v4933_v11 = vmul.f32 %v5227_v35, %v4925_v10 }
0x103d   :  { %6065 = vmatprep.subr.mxu0 %v6202_v63 }
0x103e   :  { %6066 = vmatpush3.msra.mxu0 %v4933_v11 }
0x103f   :  { %6068 = vmatmul.mubr.msk.f32.vlgmr.msra.gmra.mxu0 %vm1605_vm8, %v4935_v12 }
0x10ff   :  { %v5005_v13 = vpop.f32.mrf.mxu0 }
0x1100   :  { %5010 = vst.msk [vmem:[#allocation2] sm:$0x3] %vm5009_vm11, %v5005_v13 }
0x1101   :  { %v6069_v14 = vpop.f32.mrf.mxu0 }
0x1102   :  { %6188 = shalt.err (!%p6185_p4)
}
0x1103   :  { %5020 = dma.vmem_to_hbm [thread:$0]  %s5018_s15, 32, %s7214_s11, [#allocation3]  }
0x1104   :  { %6197 = dma.done.wait [#allocation3], 32  }
0x1105   :  { %6198 = vsyncadd [#allocation3], 4294967264 }
0x1106   :  { %5024 = vsyncpa [#allocation3], 1 }

</bundles_post_ra>
